<compile_context>
chip_gen: v5e
topology: v5e:2x2
jax: 0.10.0
libtpu: 0.0.40
codegen_flags: <defaults>
</compile_context>

<pallas_src>
import functools

import numpy as np
import jax
import jax.numpy as jnp
from jax.experimental import pallas as pl
from jax.experimental.pallas import tpu as pltpu


# ----------------------------------------------------------------------------
# Fused kernel: all LSTM layers (wavefront) + MLP head in one launch.
# ----------------------------------------------------------------------------
def make_fused_kernel(num_layers, seq_len, b_pad, hidden):
    L, T, B, H = num_layers, seq_len, b_pad, hidden
    G = 4 * H          # per-layer gate width (=128 for H=32)
    GW = L * G         # fused gate width across all layers

    def kernel(x_ref, wih0_ref, wrec_ref, bias_ref, ps_ref, po_ref,
               w1_ref, b1_ref, w2_ref, b2_ref, w3_ref, b3_ref,
               out_ref, gx_sc):
        # ---- one-time: hoisted layer-0 input projection for ALL timesteps, widened to
        #      the fused gate width so every wavefront step does a single full-width add.
        #      Biases (pre-scaled) for every layer ride along in bias_ref.
        proj = jnp.dot(x_ref[...], wih0_ref[...],
                       preferred_element_type=jnp.float32)            # (T*B, G)
        if L > 1:
            proj = jnp.concatenate(
                [proj, jnp.zeros((T * B, GW - G), jnp.float32)], axis=1)
        gx_sc[...] = proj + jnp.broadcast_to(bias_ref[...], (T * B, GW))

        # ---- hoisted loop constants (broadcast_in_dim is not CSE'd -> hoist once) ----
        wrec = wrec_ref[...]                                           # (L*H, GW)
        post_scale = jnp.broadcast_to(ps_ref[...], (B, GW))            # 0.5 on i/f/o, 1 on g
        post_offset = jnp.broadcast_to(po_ref[...], (B, GW))           # 0.5 on i/f/o, 0 on g

        h = [jnp.zeros((B, H), jnp.float32) for _ in range(L)]
        c = [jnp.zeros((B, H), jnp.float32) for _ in range(L)]

        # ---- wavefront recurrence: step s runs layer l on timestep s-l.
        #      Serial chain = T + L - 1 fused steps instead of T * L.
        for s in range(T + L - 1):
            active = [l for l in range(L) if 0 <= s - l < T]
            row = min(s, T - 1) * B            # gx row block; upper-layer bias blocks are
            addend = gx_sc[pl.ds(row, B), :]   # identical across rows, so clamping is safe
            if s == 0:
                pre = addend                   # all h states are zero -> skip the matmul
            else:
                lhs = h[0] if L == 1 else jnp.concatenate(h, axis=1)   # (B, L*H)
                pre = addend + jnp.dot(lhs, wrec,
                                       preferred_element_type=jnp.float32)
            # Single full-width tanh; sigmoid lanes recovered as 0.5*t + 0.5 (the 0.5
            # pre-scale of the i/f/o columns is already folded into the weights/biases).
            t_all = jnp.tanh(pre)
            act = t_all * post_scale + post_offset
            for l in active:
                blk = act[:, l * G:(l + 1) * G]
                i_g = blk[:, 0 * H:1 * H]
                f_g = blk[:, 1 * H:2 * H]
                g_g = blk[:, 2 * H:3 * H]
                o_g = blk[:, 3 * H:4 * H]
                c[l] = f_g * c[l] + i_g * g_g
                h[l] = o_g * jnp.tanh(c[l])

        # ---- fused MLP head on the last layer's final hidden state ----
        h1 = jnp.maximum(
            jnp.dot(h[L - 1], w1_ref[...], preferred_element_type=jnp.float32)
            + b1_ref[...], 0.0)
        h2 = jnp.maximum(
            jnp.dot(h1, w2_ref[...], preferred_element_type=jnp.float32)
            + b2_ref[...], 0.0)
        out_ref[...] = (
            jnp.dot(h2, w3_ref[...], preferred_element_type=jnp.float32) + b3_ref[...]
        )

    return kernel


def fused_forward(x_flat, kp, *, num_layers, seq_len, b_pad, hidden, o_pad):
    kernel = make_fused_kernel(num_layers, seq_len, b_pad, hidden)
    inputs = (x_flat, kp["wih0"], kp["wrec"], kp["bias_full"],
              kp["post_scale"], kp["post_offset"],
              kp["w1"], kp["b1"], kp["w2"], kp["b2"], kp["w3p"], kp["b3p"])
    return pl.pallas_call(
        kernel,
        out_shape=jax.ShapeDtypeStruct((b_pad, o_pad), jnp.float32),
        in_specs=[pl.BlockSpec(memory_space=pltpu.MemorySpace.VMEM) for _ in inputs],
        out_specs=pl.BlockSpec(memory_space=pltpu.MemorySpace.VMEM),
        scratch_shapes=[
            # hoisted fused-width input gates (layer-0 projection + all biases): ~64 KB
            pltpu.VMEM((seq_len * b_pad, num_layers * 4 * hidden), jnp.float32),
        ],
        compiler_params=pltpu.CompilerParams(vmem_limit_bytes=16 * 1024 * 1024),
    )(*inputs)


# ----------------------------------------------------------------------------
# Parameters (PyTorch-equivalent layout; weights pre-transposed for row-major matmuls)
# ----------------------------------------------------------------------------
def init_params(key, input_size, hidden_size, num_layers, output_size):
    params = {"lstm": []}
    H = hidden_size
    k_lstm = 1.0 / jnp.sqrt(jnp.float32(H))
    for layer in range(num_layers):
        in_sz = input_size if layer == 0 else hidden_size
        key, k1, k2, k3, k4 = jax.random.split(key, 5)
        w_ih = jax.random.uniform(k1, (4 * H, in_sz), jnp.float32, -k_lstm, k_lstm)
        w_hh = jax.random.uniform(k2, (4 * H, H), jnp.float32, -k_lstm, k_lstm)
        b_ih = jax.random.uniform(k3, (4 * H,), jnp.float32, -k_lstm, k_lstm)
        b_hh = jax.random.uniform(k4, (4 * H,), jnp.float32, -k_lstm, k_lstm)
        params["lstm"].append(
            dict(wih_t=w_ih.T, whh_t=w_hh.T, b_row=(b_ih + b_hh).reshape(1, 4 * H))
        )

    def linear(key, fan_in, fan_out):
        k = 1.0 / jnp.sqrt(jnp.float32(fan_in))
        key, kw, kb = jax.random.split(key, 3)
        w = jax.random.uniform(kw, (fan_in, fan_out), jnp.float32, -k, k)
        b = jax.random.uniform(kb, (1, fan_out), jnp.float32, -k, k)
        return key, w, b

    key, params["w1"], params["b1"] = linear(key, hidden_size, 64)
    key, params["w2"], params["b2"] = linear(key, 64, 32)
    key, params["w3"], params["b3"] = linear(key, 32, output_size)
    return params


def prepare_fused_params(params):
    """ONE-TIME host-side packing of kernel-ready parameters (hoisted out of the
    per-call forward path, per the performance review)."""
    lstm = params["lstm"]
    L = len(lstm)
    H = lstm[0]["whh_t"].shape[0]
    G = 4 * H
    O = params["w3"].shape[1]
    O_pad = ((O + 127) // 128) * 128

    # 0.5 pre-scale on the i/f/o gate columns (g columns untouched) so the kernel can use
    # a single tanh per fused step: sigmoid(x) = 0.5*tanh(0.5*x) + 0.5.
    col_scale = np.concatenate(
        [np.full(H, 0.5), np.full(H, 0.5), np.ones(H), np.full(H, 0.5)]
    ).astype(np.float32)
    post_scale_1 = col_scale                                    # 0.5 i/f/o, 1.0 g
    post_offset_1 = np.concatenate(
        [np.full(H, 0.5), np.full(H, 0.5), np.zeros(H), np.full(H, 0.5)]
    ).astype(np.float32)

    # Layer-0 input projection weight (pre-scaled). Bias travels in bias_full below.
    wih0 = lstm[0]["wih_t"] * jnp.asarray(col_scale)[None, :]

    # Block-diagonal fused recurrent weight: (L*H, L*4H).
    #   layer-0 gate cols : rows 0:H           = W_hh0
    #   layer-l gate cols : rows (l-1)H:lH     = W_ih_l   (previous layer's h = its input)
    #                       rows  lH:(l+1)H    = W_hh_l
    wrec = jnp.zeros((L * H, L * G), jnp.float32)
    wrec = wrec.at[0:H, 0:G].set(lstm[0]["whh_t"])
    for l in range(1, L):
        wrec = wrec.at[(l - 1) * H:l * H, l * G:(l + 1) * G].set(lstm[l]["wih_t"])
        wrec = wrec.at[l * H:(l + 1) * H, l * G:(l + 1) * G].set(lstm[l]["whh_t"])
    wrec = wrec * jnp.asarray(np.tile(col_scale, L))[None, :]

    # Fused bias row (1, L*4H), pre-scaled per gate group.
    bias_full = jnp.concatenate(
        [lstm[l]["b_row"] * jnp.asarray(col_scale)[None, :] for l in range(L)], axis=1)

    kp = dict(
        wih0=wih0,
        wrec=wrec,
        bias_full=bias_full,
        post_scale=jnp.asarray(np.tile(post_scale_1, L))[None, :],
        post_offset=jnp.asarray(np.tile(post_offset_1, L))[None, :],
        w1=params["w1"], b1=params["b1"],
        w2=params["w2"], b2=params["b2"],
        w3p=jnp.pad(params["w3"], ((0, 0), (0, O_pad - O))),   # lane-dense final store
        b3p=jnp.pad(params["b3"], ((0, 0), (0, O_pad - O))),
    )
    meta = dict(num_layers=L, hidden=H, output_size=O, o_pad=O_pad)
    return kp, meta


# ----------------------------------------------------------------------------
# Full model forward (wrapper: pad batch, time-major flatten, launch, slice back)
# ----------------------------------------------------------------------------
@functools.partial(jax.jit, static_argnames=("num_layers", "hidden", "output_size", "o_pad"))
def lstm_model_forward(kernel_params, x_bti, *, num_layers, hidden, output_size, o_pad):
    x = x_bti.astype(jnp.float32)
    B, T, I = x.shape
    B_pad = ((B + 7) // 8) * 8            # fill the f32 sublane count
    if B_pad != B:
        x = jnp.pad(x, ((0, B_pad - B), (0, 0), (0, 0)))
    # time-major, flattened: rows [t*B_pad, (t+1)*B_pad) hold timestep t
    x_flat = jnp.transpose(x, (1, 0, 2)).reshape(T * B_pad, I)
    out_pad = fused_forward(
        x_flat, kernel_params,
        num_layers=num_layers, seq_len=T, b_pad=B_pad, hidden=hidden, o_pad=o_pad,
    )                                                           # (B_pad, O_pad)
    return jnp.squeeze(out_pad[:B, :output_size])               # matches out.squeeze()


# ----------------------------------------------------------------------------
# Pure-JAX reference (for correctness check)
# ----------------------------------------------------------------------------
def reference_forward(params, x_bti):
    x = jnp.transpose(x_bti, (1, 0, 2)).astype(jnp.float32)
    for lp in params["lstm"]:
        T, B, _ = x.shape
        H = lp["whh_t"].shape[0]
        h = jnp.zeros((B, H), jnp.float32)
        c = jnp.zeros((B, H), jnp.float32)
        outs = []
        for t in range(T):
            gates = x[t] @ lp["wih_t"] + h @ lp["whh_t"] + lp["b_row"]
            i = jax.nn.sigmoid(gates[:, 0 * H:1 * H])
            f = jax.nn.sigmoid(gates[:, 1 * H:2 * H])
            g = jnp.tanh(gates[:, 2 * H:3 * H])
            o = jax.nn.sigmoid(gates[:, 3 * H:4 * H])
            c = f * c + i * g
            h = o * jnp.tanh(c)
            outs.append(h)
        x = jnp.stack(outs, axis=0)
    last = x[-1]
    h1 = jnp.maximum(last @ params["w1"] + params["b1"], 0.0)
    h2 = jnp.maximum(h1 @ params["w2"] + params["b2"], 0.0)
    return jnp.squeeze(h2 @ params["w3"] + params["b3"])


if __name__ == "__main__":
    INPUT_SIZE = 16
    HIDDEN_SIZE = 32
    LEN_DATAPOINTS = 2    # = nn.LSTM num_layers
    OUTPUT_SIZE = 4
    BATCH = 2
    SEQ = 8

    key = jax.random.PRNGKey(0)
    key, kx = jax.random.split(key)
    x = jax.random.normal(kx, (BATCH, SEQ, INPUT_SIZE), jnp.float32)

    params = init_params(key, INPUT_SIZE, HIDDEN_SIZE, LEN_DATAPOINTS, OUTPUT_SIZE)
    kp, meta = prepare_fused_params(params)      # one-time host-side packing

    out = lstm_model_forward(
        kp, x,
        num_layers=meta["num_layers"], hidden=meta["hidden"],
        output_size=meta["output_size"], o_pad=meta["o_pad"],
    )
    out = jax.block_until_ready(out)

    ref = jax.block_until_ready(reference_forward(params, x))
    assert out.shape == ref.shape, (out.shape, ref.shape)
    max_err = float(jnp.max(jnp.abs(out - ref)))
    assert jnp.allclose(out, ref, atol=2e-4, rtol=2e-4), f"mismatch vs reference: {max_err}"

    print("KERNEL_OK")
</pallas_src>

<mosaic_0001>
module attributes {stable_mosaic.version = 11 : i64} {
  func.func @kernel(%arg0: memref<64x16xf32, #tpu.memory_space<vmem>>, %arg1: memref<16x128xf32, #tpu.memory_space<vmem>>, %arg2: memref<64x256xf32, #tpu.memory_space<vmem>>, %arg3: memref<1x256xf32, #tpu.memory_space<vmem>>, %arg4: memref<1x256xf32, #tpu.memory_space<vmem>>, %arg5: memref<1x256xf32, #tpu.memory_space<vmem>>, %arg6: memref<32x64xf32, #tpu.memory_space<vmem>>, %arg7: memref<1x64xf32, #tpu.memory_space<vmem>>, %arg8: memref<64x32xf32, #tpu.memory_space<vmem>>, %arg9: memref<1x32xf32, #tpu.memory_space<vmem>>, %arg10: memref<32x128xf32, #tpu.memory_space<vmem>>, %arg11: memref<1x128xf32, #tpu.memory_space<vmem>>, %arg12: memref<8x128xf32, #tpu.memory_space<vmem>>, %arg13: memref<64x256xf32, #tpu.memory_space<vmem>>) attributes {dimension_semantics = [], scalar_prefetch = 0 : i64, scratch_operands = 1 : i64, tpu.core_type = #tpu.core_type<tc>} {
    %c0 = arith.constant 0 : index
    %c0_0 = arith.constant 0 : index
    %0 = vector.load %arg0[%c0, %c0_0] : memref<64x16xf32, #tpu.memory_space<vmem>>, vector<64x16xf32>
    %c0_1 = arith.constant 0 : index
    %c0_2 = arith.constant 0 : index
    %1 = vector.load %arg1[%c0_1, %c0_2] : memref<16x128xf32, #tpu.memory_space<vmem>>, vector<16x128xf32>
    %cst = arith.constant dense<0.000000e+00> : vector<64x128xf32>
    %2 = tpu.matmul %0, %1, %cst {dimension_numbers = #tpu.dot_dimension_numbers<[1], [0], [0], [1], [0, 0, 1, 1], [], []>} : vector<64x16xf32>, vector<16x128xf32>, vector<64x128xf32> -> vector<64x128xf32>
    %cst_3 = arith.constant 0.000000e+00 : f32
    %3 = vector.broadcast %cst_3 : f32 to vector<64x128xf32>
    %4 = tpu.concatenate %2, %3 in 1 : vector<64x128xf32>, vector<64x128xf32> -> vector<64x256xf32>
    %c0_4 = arith.constant 0 : index
    %c0_5 = arith.constant 0 : index
    %5 = vector.load %arg3[%c0_4, %c0_5] : memref<1x256xf32, #tpu.memory_space<vmem>>, vector<1x256xf32>
    %6 = vector.shape_cast %5 : vector<1x256xf32> to vector<1x256xf32>
    %7 = vector.broadcast %6 : vector<1x256xf32> to vector<64x256xf32>
    %8 = arith.addf %4, %7 : vector<64x256xf32>
    %c0_6 = arith.constant 0 : index
    %c0_7 = arith.constant 0 : index
    %9 = vector.load %arg13[%c0_6, %c0_7] : memref<64x256xf32, #tpu.memory_space<vmem>>, vector<64x256xf32>
    tpu.vector_store %arg13[%c0_6, %c0_7], %8 {strides = array<i32>} : memref<64x256xf32, #tpu.memory_space<vmem>>, vector<64x256xf32>,
    %c0_8 = arith.constant 0 : index
    %c0_9 = arith.constant 0 : index
    %10 = vector.load %arg2[%c0_8, %c0_9] : memref<64x256xf32, #tpu.memory_space<vmem>>, vector<64x256xf32>
    %c0_10 = arith.constant 0 : index
    %c0_11 = arith.constant 0 : index
    %11 = vector.load %arg4[%c0_10, %c0_11] : memref<1x256xf32, #tpu.memory_space<vmem>>, vector<1x256xf32>
    %12 = vector.shape_cast %11 : vector<1x256xf32> to vector<1x256xf32>
    %13 = vector.broadcast %12 : vector<1x256xf32> to vector<8x256xf32>
    %c0_12 = arith.constant 0 : index
    %c0_13 = arith.constant 0 : index
    %14 = vector.load %arg5[%c0_12, %c0_13] : memref<1x256xf32, #tpu.memory_space<vmem>>, vector<1x256xf32>
    %15 = vector.shape_cast %14 : vector<1x256xf32> to vector<1x256xf32>
    %16 = vector.broadcast %15 : vector<1x256xf32> to vector<8x256xf32>
    %cst_14 = arith.constant 0.000000e+00 : f32
    %17 = vector.broadcast %cst_14 : f32 to vector<8x32xf32>
    %cst_15 = arith.constant 0.000000e+00 : f32
    %18 = vector.broadcast %cst_15 : f32 to vector<8x32xf32>
    %cst_16 = arith.constant 0.000000e+00 : f32
    %19 = vector.broadcast %cst_16 : f32 to vector<8x32xf32>
    %c0_17 = arith.constant 0 : index
    %c0_18 = arith.constant 0 : index
    %20 = vector.load %arg13[%c0_17, %c0_18] : memref<64x256xf32, #tpu.memory_space<vmem>>, vector<8x256xf32>
    %21 = math.tanh %20 : vector<8x256xf32>
    %22 = arith.mulf %21, %13 : vector<8x256xf32>
    %23 = arith.addf %22, %16 : vector<8x256xf32>
    %24 = vector.extract_strided_slice %23 {offsets = [0, 0], sizes = [8, 128], strides = [1, 1]} : vector<8x256xf32> to vector<8x128xf32>
    %25 = vector.extract_strided_slice %24 {offsets = [0, 0], sizes = [8, 32], strides = [1, 1]} : vector<8x128xf32> to vector<8x32xf32>
    %26 = vector.extract_strided_slice %24 {offsets = [0, 32], sizes = [8, 32], strides = [1, 1]} : vector<8x128xf32> to vector<8x32xf32>
    %27 = vector.extract_strided_slice %24 {offsets = [0, 64], sizes = [8, 32], strides = [1, 1]} : vector<8x128xf32> to vector<8x32xf32>
    %28 = vector.extract_strided_slice %24 {offsets = [0, 96], sizes = [8, 32], strides = [1, 1]} : vector<8x128xf32> to vector<8x32xf32>
    %29 = arith.mulf %26, %18 : vector<8x32xf32>
    %30 = arith.mulf %25, %27 : vector<8x32xf32>
    %31 = arith.addf %29, %30 : vector<8x32xf32>
    %32 = math.tanh %31 : vector<8x32xf32>
    %33 = arith.mulf %28, %32 : vector<8x32xf32>
    %c8 = arith.constant 8 : index
    %c0_19 = arith.constant 0 : index
    %34 = vector.load %arg13[%c8, %c0_19] : memref<64x256xf32, #tpu.memory_space<vmem>>, vector<8x256xf32>
    %35 = tpu.concatenate %33, %17 in 1 : vector<8x32xf32>, vector<8x32xf32> -> vector<8x64xf32>
    %cst_20 = arith.constant dense<0.000000e+00> : vector<8x256xf32>
    %36 = tpu.matmul %35, %10, %cst_20 {dimension_numbers = #tpu.dot_dimension_numbers<[1], [0], [0], [1], [0, 0, 1, 1], [], []>} : vector<8x64xf32>, vector<64x256xf32>, vector<8x256xf32> -> vector<8x256xf32>
    %37 = arith.addf %34, %36 : vector<8x256xf32>
    %38 = math.tanh %37 : vector<8x256xf32>
    %39 = arith.mulf %38, %13 : vector<8x256xf32>
    %40 = arith.addf %39, %16 : vector<8x256xf32>
    %41 = vector.extract_strided_slice %40 {offsets = [0, 0], sizes = [8, 128], strides = [1, 1]} : vector<8x256xf32> to vector<8x128xf32>
    %42 = vector.extract_strided_slice %41 {offsets = [0, 0], sizes = [8, 32], strides = [1, 1]} : vector<8x128xf32> to vector<8x32xf32>
    %43 = vector.extract_strided_slice %41 {offsets = [0, 32], sizes = [8, 32], strides = [1, 1]} : vector<8x128xf32> to vector<8x32xf32>
    %44 = vector.extract_strided_slice %41 {offsets = [0, 64], sizes = [8, 32], strides = [1, 1]} : vector<8x128xf32> to vector<8x32xf32>
    %45 = vector.extract_strided_slice %41 {offsets = [0, 96], sizes = [8, 32], strides = [1, 1]} : vector<8x128xf32> to vector<8x32xf32>
    %46 = arith.mulf %43, %31 : vector<8x32xf32>
    %47 = arith.mulf %42, %44 : vector<8x32xf32>
    %48 = arith.addf %46, %47 : vector<8x32xf32>
    %49 = math.tanh %48 : vector<8x32xf32>
    %50 = arith.mulf %45, %49 : vector<8x32xf32>
    %51 = vector.extract_strided_slice %40 {offsets = [0, 128], sizes = [8, 128], strides = [1, 1]} : vector<8x256xf32> to vector<8x128xf32>
    %52 = vector.extract_strided_slice %51 {offsets = [0, 0], sizes = [8, 32], strides = [1, 1]} : vector<8x128xf32> to vector<8x32xf32>
    %53 = vector.extract_strided_slice %51 {offsets = [0, 32], sizes = [8, 32], strides = [1, 1]} : vector<8x128xf32> to vector<8x32xf32>
    %54 = vector.extract_strided_slice %51 {offsets = [0, 64], sizes = [8, 32], strides = [1, 1]} : vector<8x128xf32> to vector<8x32xf32>
    %55 = vector.extract_strided_slice %51 {offsets = [0, 96], sizes = [8, 32], strides = [1, 1]} : vector<8x128xf32> to vector<8x32xf32>
    %56 = arith.mulf %53, %19 : vector<8x32xf32>
    %57 = arith.mulf %52, %54 : vector<8x32xf32>
    %58 = arith.addf %56, %57 : vector<8x32xf32>
    %59 = math.tanh %58 : vector<8x32xf32>
    %60 = arith.mulf %55, %59 : vector<8x32xf32>
    %c16 = arith.constant 16 : index
    %c0_21 = arith.constant 0 : index
    %61 = vector.load %arg13[%c16, %c0_21] : memref<64x256xf32, #tpu.memory_space<vmem>>, vector<8x256xf32>
    %62 = tpu.concatenate %50, %60 in 1 : vector<8x32xf32>, vector<8x32xf32> -> vector<8x64xf32>
    %cst_22 = arith.constant dense<0.000000e+00> : vector<8x256xf32>
    %63 = tpu.matmul %62, %10, %cst_22 {dimension_numbers = #tpu.dot_dimension_numbers<[1], [0], [0], [1], [0, 0, 1, 1], [], []>} : vector<8x64xf32>, vector<64x256xf32>, vector<8x256xf32> -> vector<8x256xf32>
    %64 = arith.addf %61, %63 : vector<8x256xf32>
    %65 = math.tanh %64 : vector<8x256xf32>
    %66 = arith.mulf %65, %13 : vector<8x256xf32>
    %67 = arith.addf %66, %16 : vector<8x256xf32>
    %68 = vector.extract_strided_slice %67 {offsets = [0, 0], sizes = [8, 128], strides = [1, 1]} : vector<8x256xf32> to vector<8x128xf32>
    %69 = vector.extract_strided_slice %68 {offsets = [0, 0], sizes = [8, 32], strides = [1, 1]} : vector<8x128xf32> to vector<8x32xf32>
    %70 = vector.extract_strided_slice %68 {offsets = [0, 32], sizes = [8, 32], strides = [1, 1]} : vector<8x128xf32> to vector<8x32xf32>
    %71 = vector.extract_strided_slice %68 {offsets = [0, 64], sizes = [8, 32], strides = [1, 1]} : vector<8x128xf32> to vector<8x32xf32>
    %72 = vector.extract_strided_slice %68 {offsets = [0, 96], sizes = [8, 32], strides = [1, 1]} : vector<8x128xf32> to vector<8x32xf32>
    %73 = arith.mulf %70, %48 : vector<8x32xf32>
    %74 = arith.mulf %69, %71 : vector<8x32xf32>
    %75 = arith.addf %73, %74 : vector<8x32xf32>
    %76 = math.tanh %75 : vector<8x32xf32>
    %77 = arith.mulf %72, %76 : vector<8x32xf32>
    %78 = vector.extract_strided_slice %67 {offsets = [0, 128], sizes = [8, 128], strides = [1, 1]} : vector<8x256xf32> to vector<8x128xf32>
    %79 = vector.extract_strided_slice %78 {offsets = [0, 0], sizes = [8, 32], strides = [1, 1]} : vector<8x128xf32> to vector<8x32xf32>
    %80 = vector.extract_strided_slice %78 {offsets = [0, 32], sizes = [8, 32], strides = [1, 1]} : vector<8x128xf32> to vector<8x32xf32>
    %81 = vector.extract_strided_slice %78 {offsets = [0, 64], sizes = [8, 32], strides = [1, 1]} : vector<8x128xf32> to vector<8x32xf32>
    %82 = vector.extract_strided_slice %78 {offsets = [0, 96], sizes = [8, 32], strides = [1, 1]} : vector<8x128xf32> to vector<8x32xf32>
    %83 = arith.mulf %80, %58 : vector<8x32xf32>
    %84 = arith.mulf %79, %81 : vector<8x32xf32>
    %85 = arith.addf %83, %84 : vector<8x32xf32>
    %86 = math.tanh %85 : vector<8x32xf32>
    %87 = arith.mulf %82, %86 : vector<8x32xf32>
    %c24 = arith.constant 24 : index
    %c0_23 = arith.constant 0 : index
    %88 = vector.load %arg13[%c24, %c0_23] : memref<64x256xf32, #tpu.memory_space<vmem>>, vector<8x256xf32>
    %89 = tpu.concatenate %77, %87 in 1 : vector<8x32xf32>, vector<8x32xf32> -> vector<8x64xf32>
    %cst_24 = arith.constant dense<0.000000e+00> : vector<8x256xf32>
    %90 = tpu.matmul %89, %10, %cst_24 {dimension_numbers = #tpu.dot_dimension_numbers<[1], [0], [0], [1], [0, 0, 1, 1], [], []>} : vector<8x64xf32>, vector<64x256xf32>, vector<8x256xf32> -> vector<8x256xf32>
    %91 = arith.addf %88, %90 : vector<8x256xf32>
    %92 = math.tanh %91 : vector<8x256xf32>
    %93 = arith.mulf %92, %13 : vector<8x256xf32>
    %94 = arith.addf %93, %16 : vector<8x256xf32>
    %95 = vector.extract_strided_slice %94 {offsets = [0, 0], sizes = [8, 128], strides = [1, 1]} : vector<8x256xf32> to vector<8x128xf32>
    %96 = vector.extract_strided_slice %95 {offsets = [0, 0], sizes = [8, 32], strides = [1, 1]} : vector<8x128xf32> to vector<8x32xf32>
    %97 = vector.extract_strided_slice %95 {offsets = [0, 32], sizes = [8, 32], strides = [1, 1]} : vector<8x128xf32> to vector<8x32xf32>
    %98 = vector.extract_strided_slice %95 {offsets = [0, 64], sizes = [8, 32], strides = [1, 1]} : vector<8x128xf32> to vector<8x32xf32>
    %99 = vector.extract_strided_slice %95 {offsets = [0, 96], sizes = [8, 32], strides = [1, 1]} : vector<8x128xf32> to vector<8x32xf32>
    %100 = arith.mulf %97, %75 : vector<8x32xf32>
    %101 = arith.mulf %96, %98 : vector<8x32xf32>
    %102 = arith.addf %100, %101 : vector<8x32xf32>
    %103 = math.tanh %102 : vector<8x32xf32>
    %104 = arith.mulf %99, %103 : vector<8x32xf32>
    %105 = vector.extract_strided_slice %94 {offsets = [0, 128], sizes = [8, 128], strides = [1, 1]} : vector<8x256xf32> to vector<8x128xf32>
    %106 = vector.extract_strided_slice %105 {offsets = [0, 0], sizes = [8, 32], strides = [1, 1]} : vector<8x128xf32> to vector<8x32xf32>
    %107 = vector.extract_strided_slice %105 {offsets = [0, 32], sizes = [8, 32], strides = [1, 1]} : vector<8x128xf32> to vector<8x32xf32>
    %108 = vector.extract_strided_slice %105 {offsets = [0, 64], sizes = [8, 32], strides = [1, 1]} : vector<8x128xf32> to vector<8x32xf32>
    %109 = vector.extract_strided_slice %105 {offsets = [0, 96], sizes = [8, 32], strides = [1, 1]} : vector<8x128xf32> to vector<8x32xf32>
    %110 = arith.mulf %107, %85 : vector<8x32xf32>
    %111 = arith.mulf %106, %108 : vector<8x32xf32>
    %112 = arith.addf %110, %111 : vector<8x32xf32>
    %113 = math.tanh %112 : vector<8x32xf32>
    %114 = arith.mulf %109, %113 : vector<8x32xf32>
    %c32 = arith.constant 32 : index
    %c0_25 = arith.constant 0 : index
    %115 = vector.load %arg13[%c32, %c0_25] : memref<64x256xf32, #tpu.memory_space<vmem>>, vector<8x256xf32>
    %116 = tpu.concatenate %104, %114 in 1 : vector<8x32xf32>, vector<8x32xf32> -> vector<8x64xf32>
    %cst_26 = arith.constant dense<0.000000e+00> : vector<8x256xf32>
    %117 = tpu.matmul %116, %10, %cst_26 {dimension_numbers = #tpu.dot_dimension_numbers<[1], [0], [0], [1], [0, 0, 1, 1], [], []>} : vector<8x64xf32>, vector<64x256xf32>, vector<8x256xf32> -> vector<8x256xf32>
    %118 = arith.addf %115, %117 : vector<8x256xf32>
    %119 = math.tanh %118 : vector<8x256xf32>
    %120 = arith.mulf %119, %13 : vector<8x256xf32>
    %121 = arith.addf %120, %16 : vector<8x256xf32>
    %122 = vector.extract_strided_slice %121 {offsets = [0, 0], sizes = [8, 128], strides = [1, 1]} : vector<8x256xf32> to vector<8x128xf32>
    %123 = vector.extract_strided_slice %122 {offsets = [0, 0], sizes = [8, 32], strides = [1, 1]} : vector<8x128xf32> to vector<8x32xf32>
    %124 = vector.extract_strided_slice %122 {offsets = [0, 32], sizes = [8, 32], strides = [1, 1]} : vector<8x128xf32> to vector<8x32xf32>
    %125 = vector.extract_strided_slice %122 {offsets = [0, 64], sizes = [8, 32], strides = [1, 1]} : vector<8x128xf32> to vector<8x32xf32>
    %126 = vector.extract_strided_slice %122 {offsets = [0, 96], sizes = [8, 32], strides = [1, 1]} : vector<8x128xf32> to vector<8x32xf32>
    %127 = arith.mulf %124, %102 : vector<8x32xf32>
    %128 = arith.mulf %123, %125 : vector<8x32xf32>
    %129 = arith.addf %127, %128 : vector<8x32xf32>
    %130 = math.tanh %129 : vector<8x32xf32>
    %131 = arith.mulf %126, %130 : vector<8x32xf32>
    %132 = vector.extract_strided_slice %121 {offsets = [0, 128], sizes = [8, 128], strides = [1, 1]} : vector<8x256xf32> to vector<8x128xf32>
    %133 = vector.extract_strided_slice %132 {offsets = [0, 0], sizes = [8, 32], strides = [1, 1]} : vector<8x128xf32> to vector<8x32xf32>
    %134 = vector.extract_strided_slice %132 {offsets = [0, 32], sizes = [8, 32], strides = [1, 1]} : vector<8x128xf32> to vector<8x32xf32>
    %135 = vector.extract_strided_slice %132 {offsets = [0, 64], sizes = [8, 32], strides = [1, 1]} : vector<8x128xf32> to vector<8x32xf32>
    %136 = vector.extract_strided_slice %132 {offsets = [0, 96], sizes = [8, 32], strides = [1, 1]} : vector<8x128xf32> to vector<8x32xf32>
    %137 = arith.mulf %134, %112 : vector<8x32xf32>
    %138 = arith.mulf %133, %135 : vector<8x32xf32>
    %139 = arith.addf %137, %138 : vector<8x32xf32>
    %140 = math.tanh %139 : vector<8x32xf32>
    %141 = arith.mulf %136, %140 : vector<8x32xf32>
    %c40 = arith.constant 40 : index
    %c0_27 = arith.constant 0 : index
    %142 = vector.load %arg13[%c40, %c0_27] : memref<64x256xf32, #tpu.memory_space<vmem>>, vector<8x256xf32>
    %143 = tpu.concatenate %131, %141 in 1 : vector<8x32xf32>, vector<8x32xf32> -> vector<8x64xf32>
    %cst_28 = arith.constant dense<0.000000e+00> : vector<8x256xf32>
    %144 = tpu.matmul %143, %10, %cst_28 {dimension_numbers = #tpu.dot_dimension_numbers<[1], [0], [0], [1], [0, 0, 1, 1], [], []>} : vector<8x64xf32>, vector<64x256xf32>, vector<8x256xf32> -> vector<8x256xf32>
    %145 = arith.addf %142, %144 : vector<8x256xf32>
    %146 = math.tanh %145 : vector<8x256xf32>
    %147 = arith.mulf %146, %13 : vector<8x256xf32>
    %148 = arith.addf %147, %16 : vector<8x256xf32>
    %149 = vector.extract_strided_slice %148 {offsets = [0, 0], sizes = [8, 128], strides = [1, 1]} : vector<8x256xf32> to vector<8x128xf32>
    %150 = vector.extract_strided_slice %149 {offsets = [0, 0], sizes = [8, 32], strides = [1, 1]} : vector<8x128xf32> to vector<8x32xf32>
    %151 = vector.extract_strided_slice %149 {offsets = [0, 32], sizes = [8, 32], strides = [1, 1]} : vector<8x128xf32> to vector<8x32xf32>
    %152 = vector.extract_strided_slice %149 {offsets = [0, 64], sizes = [8, 32], strides = [1, 1]} : vector<8x128xf32> to vector<8x32xf32>
    %153 = vector.extract_strided_slice %149 {offsets = [0, 96], sizes = [8, 32], strides = [1, 1]} : vector<8x128xf32> to vector<8x32xf32>
    %154 = arith.mulf %151, %129 : vector<8x32xf32>
    %155 = arith.mulf %150, %152 : vector<8x32xf32>
    %156 = arith.addf %154, %155 : vector<8x32xf32>
    %157 = math.tanh %156 : vector<8x32xf32>
    %158 = arith.mulf %153, %157 : vector<8x32xf32>
    %159 = vector.extract_strided_slice %148 {offsets = [0, 128], sizes = [8, 128], strides = [1, 1]} : vector<8x256xf32> to vector<8x128xf32>
    %160 = vector.extract_strided_slice %159 {offsets = [0, 0], sizes = [8, 32], strides = [1, 1]} : vector<8x128xf32> to vector<8x32xf32>
    %161 = vector.extract_strided_slice %159 {offsets = [0, 32], sizes = [8, 32], strides = [1, 1]} : vector<8x128xf32> to vector<8x32xf32>
    %162 = vector.extract_strided_slice %159 {offsets = [0, 64], sizes = [8, 32], strides = [1, 1]} : vector<8x128xf32> to vector<8x32xf32>
    %163 = vector.extract_strided_slice %159 {offsets = [0, 96], sizes = [8, 32], strides = [1, 1]} : vector<8x128xf32> to vector<8x32xf32>
    %164 = arith.mulf %161, %139 : vector<8x32xf32>
    %165 = arith.mulf %160, %162 : vector<8x32xf32>
    %166 = arith.addf %164, %165 : vector<8x32xf32>
    %167 = math.tanh %166 : vector<8x32xf32>
    %168 = arith.mulf %163, %167 : vector<8x32xf32>
    %c48 = arith.constant 48 : index
    %c0_29 = arith.constant 0 : index
    %169 = vector.load %arg13[%c48, %c0_29] : memref<64x256xf32, #tpu.memory_space<vmem>>, vector<8x256xf32>
    %170 = tpu.concatenate %158, %168 in 1 : vector<8x32xf32>, vector<8x32xf32> -> vector<8x64xf32>
    %cst_30 = arith.constant dense<0.000000e+00> : vector<8x256xf32>
    %171 = tpu.matmul %170, %10, %cst_30 {dimension_numbers = #tpu.dot_dimension_numbers<[1], [0], [0], [1], [0, 0, 1, 1], [], []>} : vector<8x64xf32>, vector<64x256xf32>, vector<8x256xf32> -> vector<8x256xf32>
    %172 = arith.addf %169, %171 : vector<8x256xf32>
    %173 = math.tanh %172 : vector<8x256xf32>
    %174 = arith.mulf %173, %13 : vector<8x256xf32>
    %175 = arith.addf %174, %16 : vector<8x256xf32>
    %176 = vector.extract_strided_slice %175 {offsets = [0, 0], sizes = [8, 128], strides = [1, 1]} : vector<8x256xf32> to vector<8x128xf32>
    %177 = vector.extract_strided_slice %176 {offsets = [0, 0], sizes = [8, 32], strides = [1, 1]} : vector<8x128xf32> to vector<8x32xf32>
    %178 = vector.extract_strided_slice %176 {offsets = [0, 32], sizes = [8, 32], strides = [1, 1]} : vector<8x128xf32> to vector<8x32xf32>
    %179 = vector.extract_strided_slice %176 {offsets = [0, 64], sizes = [8, 32], strides = [1, 1]} : vector<8x128xf32> to vector<8x32xf32>
    %180 = vector.extract_strided_slice %176 {offsets = [0, 96], sizes = [8, 32], strides = [1, 1]} : vector<8x128xf32> to vector<8x32xf32>
    %181 = arith.mulf %178, %156 : vector<8x32xf32>
    %182 = arith.mulf %177, %179 : vector<8x32xf32>
    %183 = arith.addf %181, %182 : vector<8x32xf32>
    %184 = math.tanh %183 : vector<8x32xf32>
    %185 = arith.mulf %180, %184 : vector<8x32xf32>
    %186 = vector.extract_strided_slice %175 {offsets = [0, 128], sizes = [8, 128], strides = [1, 1]} : vector<8x256xf32> to vector<8x128xf32>
    %187 = vector.extract_strided_slice %186 {offsets = [0, 0], sizes = [8, 32], strides = [1, 1]} : vector<8x128xf32> to vector<8x32xf32>
    %188 = vector.extract_strided_slice %186 {offsets = [0, 32], sizes = [8, 32], strides = [1, 1]} : vector<8x128xf32> to vector<8x32xf32>
    %189 = vector.extract_strided_slice %186 {offsets = [0, 64], sizes = [8, 32], strides = [1, 1]} : vector<8x128xf32> to vector<8x32xf32>
    %190 = vector.extract_strided_slice %186 {offsets = [0, 96], sizes = [8, 32], strides = [1, 1]} : vector<8x128xf32> to vector<8x32xf32>
    %191 = arith.mulf %188, %166 : vector<8x32xf32>
    %192 = arith.mulf %187, %189 : vector<8x32xf32>
    %193 = arith.addf %191, %192 : vector<8x32xf32>
    %194 = math.tanh %193 : vector<8x32xf32>
    %195 = arith.mulf %190, %194 : vector<8x32xf32>
    %c56 = arith.constant 56 : index
    %c0_31 = arith.constant 0 : index
    %196 = vector.load %arg13[%c56, %c0_31] : memref<64x256xf32, #tpu.memory_space<vmem>>, vector<8x256xf32>
    %197 = tpu.concatenate %185, %195 in 1 : vector<8x32xf32>, vector<8x32xf32> -> vector<8x64xf32>
    %cst_32 = arith.constant dense<0.000000e+00> : vector<8x256xf32>
    %198 = tpu.matmul %197, %10, %cst_32 {dimension_numbers = #tpu.dot_dimension_numbers<[1], [0], [0], [1], [0, 0, 1, 1], [], []>} : vector<8x64xf32>, vector<64x256xf32>, vector<8x256xf32> -> vector<8x256xf32>
    %199 = arith.addf %196, %198 : vector<8x256xf32>
    %200 = math.tanh %199 : vector<8x256xf32>
    %201 = arith.mulf %200, %13 : vector<8x256xf32>
    %202 = arith.addf %201, %16 : vector<8x256xf32>
    %203 = vector.extract_strided_slice %202 {offsets = [0, 0], sizes = [8, 128], strides = [1, 1]} : vector<8x256xf32> to vector<8x128xf32>
    %204 = vector.extract_strided_slice %203 {offsets = [0, 0], sizes = [8, 32], strides = [1, 1]} : vector<8x128xf32> to vector<8x32xf32>
    %205 = vector.extract_strided_slice %203 {offsets = [0, 32], sizes = [8, 32], strides = [1, 1]} : vector<8x128xf32> to vector<8x32xf32>
    %206 = vector.extract_strided_slice %203 {offsets = [0, 64], sizes = [8, 32], strides = [1, 1]} : vector<8x128xf32> to vector<8x32xf32>
    %207 = vector.extract_strided_slice %203 {offsets = [0, 96], sizes = [8, 32], strides = [1, 1]} : vector<8x128xf32> to vector<8x32xf32>
    %208 = arith.mulf %205, %183 : vector<8x32xf32>
    %209 = arith.mulf %204, %206 : vector<8x32xf32>
    %210 = arith.addf %208, %209 : vector<8x32xf32>
    %211 = math.tanh %210 : vector<8x32xf32>
    %212 = arith.mulf %207, %211 : vector<8x32xf32>
    %213 = vector.extract_strided_slice %202 {offsets = [0, 128], sizes = [8, 128], strides = [1, 1]} : vector<8x256xf32> to vector<8x128xf32>
    %214 = vector.extract_strided_slice %213 {offsets = [0, 0], sizes = [8, 32], strides = [1, 1]} : vector<8x128xf32> to vector<8x32xf32>
    %215 = vector.extract_strided_slice %213 {offsets = [0, 32], sizes = [8, 32], strides = [1, 1]} : vector<8x128xf32> to vector<8x32xf32>
    %216 = vector.extract_strided_slice %213 {offsets = [0, 64], sizes = [8, 32], strides = [1, 1]} : vector<8x128xf32> to vector<8x32xf32>
    %217 = vector.extract_strided_slice %213 {offsets = [0, 96], sizes = [8, 32], strides = [1, 1]} : vector<8x128xf32> to vector<8x32xf32>
    %218 = arith.mulf %215, %193 : vector<8x32xf32>
    %219 = arith.mulf %214, %216 : vector<8x32xf32>
    %220 = arith.addf %218, %219 : vector<8x32xf32>
    %221 = math.tanh %220 : vector<8x32xf32>
    %222 = arith.mulf %217, %221 : vector<8x32xf32>
    %c56_33 = arith.constant 56 : index
    %c0_34 = arith.constant 0 : index
    %223 = vector.load %arg13[%c56_33, %c0_34] : memref<64x256xf32, #tpu.memory_space<vmem>>, vector<8x256xf32>
    %224 = tpu.concatenate %212, %222 in 1 : vector<8x32xf32>, vector<8x32xf32> -> vector<8x64xf32>
    %cst_35 = arith.constant dense<0.000000e+00> : vector<8x256xf32>
    %225 = tpu.matmul %224, %10, %cst_35 {dimension_numbers = #tpu.dot_dimension_numbers<[1], [0], [0], [1], [0, 0, 1, 1], [], []>} : vector<8x64xf32>, vector<64x256xf32>, vector<8x256xf32> -> vector<8x256xf32>
    %226 = arith.addf %223, %225 : vector<8x256xf32>
    %227 = math.tanh %226 : vector<8x256xf32>
    %228 = arith.mulf %227, %13 : vector<8x256xf32>
    %229 = arith.addf %228, %16 : vector<8x256xf32>
    %230 = vector.extract_strided_slice %229 {offsets = [0, 128], sizes = [8, 128], strides = [1, 1]} : vector<8x256xf32> to vector<8x128xf32>
    %231 = vector.extract_strided_slice %230 {offsets = [0, 0], sizes = [8, 32], strides = [1, 1]} : vector<8x128xf32> to vector<8x32xf32>
    %232 = vector.extract_strided_slice %230 {offsets = [0, 32], sizes = [8, 32], strides = [1, 1]} : vector<8x128xf32> to vector<8x32xf32>
    %233 = vector.extract_strided_slice %230 {offsets = [0, 64], sizes = [8, 32], strides = [1, 1]} : vector<8x128xf32> to vector<8x32xf32>
    %234 = vector.extract_strided_slice %230 {offsets = [0, 96], sizes = [8, 32], strides = [1, 1]} : vector<8x128xf32> to vector<8x32xf32>
    %235 = arith.mulf %232, %220 : vector<8x32xf32>
    %236 = arith.mulf %231, %233 : vector<8x32xf32>
    %237 = arith.addf %235, %236 : vector<8x32xf32>
    %238 = math.tanh %237 : vector<8x32xf32>
    %239 = arith.mulf %234, %238 : vector<8x32xf32>
    %c0_36 = arith.constant 0 : index
    %c0_37 = arith.constant 0 : index
    %240 = vector.load %arg6[%c0_36, %c0_37] : memref<32x64xf32, #tpu.memory_space<vmem>>, vector<32x64xf32>
    %cst_38 = arith.constant dense<0.000000e+00> : vector<8x64xf32>
    %241 = tpu.matmul %239, %240, %cst_38 {dimension_numbers = #tpu.dot_dimension_numbers<[1], [0], [0], [1], [0, 0, 1, 1], [], []>} : vector<8x32xf32>, vector<32x64xf32>, vector<8x64xf32> -> vector<8x64xf32>
    %c0_39 = arith.constant 0 : index
    %c0_40 = arith.constant 0 : index
    %242 = vector.load %arg7[%c0_39, %c0_40] : memref<1x64xf32, #tpu.memory_space<vmem>>, vector<1x64xf32>
    %243 = vector.broadcast %242 : vector<1x64xf32> to vector<8x64xf32>
    %244 = arith.addf %241, %243 : vector<8x64xf32>
    %cst_41 = arith.constant 0.000000e+00 : f32
    %245 = vector.broadcast %cst_41 : f32 to vector<8x64xf32>
    %246 = arith.maximumf %244, %245 : vector<8x64xf32>
    %c0_42 = arith.constant 0 : index
    %c0_43 = arith.constant 0 : index
    %247 = vector.load %arg8[%c0_42, %c0_43] : memref<64x32xf32, #tpu.memory_space<vmem>>, vector<64x32xf32>
    %cst_44 = arith.constant dense<0.000000e+00> : vector<8x32xf32>
    %248 = tpu.matmul %246, %247, %cst_44 {dimension_numbers = #tpu.dot_dimension_numbers<[1], [0], [0], [1], [0, 0, 1, 1], [], []>} : vector<8x64xf32>, vector<64x32xf32>, vector<8x32xf32> -> vector<8x32xf32>
    %c0_45 = arith.constant 0 : index
    %c0_46 = arith.constant 0 : index
    %249 = vector.load %arg9[%c0_45, %c0_46] : memref<1x32xf32, #tpu.memory_space<vmem>>, vector<1x32xf32>
    %250 = vector.broadcast %249 : vector<1x32xf32> to vector<8x32xf32>
    %251 = arith.addf %248, %250 : vector<8x32xf32>
    %cst_47 = arith.constant 0.000000e+00 : f32
    %252 = vector.broadcast %cst_47 : f32 to vector<8x32xf32>
    %253 = arith.maximumf %251, %252 : vector<8x32xf32>
    %c0_48 = arith.constant 0 : index
    %c0_49 = arith.constant 0 : index
    %254 = vector.load %arg10[%c0_48, %c0_49] : memref<32x128xf32, #tpu.memory_space<vmem>>, vector<32x128xf32>
    %cst_50 = arith.constant dense<0.000000e+00> : vector<8x128xf32>
    %255 = tpu.matmul %253, %254, %cst_50 {dimension_numbers = #tpu.dot_dimension_numbers<[1], [0], [0], [1], [0, 0, 1, 1], [], []>} : vector<8x32xf32>, vector<32x128xf32>, vector<8x128xf32> -> vector<8x128xf32>
    %c0_51 = arith.constant 0 : index
    %c0_52 = arith.constant 0 : index
    %256 = vector.load %arg11[%c0_51, %c0_52] : memref<1x128xf32, #tpu.memory_space<vmem>>, vector<1x128xf32>
    %257 = vector.broadcast %256 : vector<1x128xf32> to vector<8x128xf32>
    %258 = arith.addf %255, %257 : vector<8x128xf32>
    %c0_53 = arith.constant 0 : index
    %c0_54 = arith.constant 0 : index
    %259 = vector.load %arg12[%c0_53, %c0_54] : memref<8x128xf32, #tpu.memory_space<vmem>>, vector<8x128xf32>
    tpu.vector_store %arg12[%c0_53, %c0_54], %258 {strides = array<i32>} : memref<8x128xf32, #tpu.memory_space<vmem>>, vector<8x128xf32>,
    return
  }
}

</mosaic_0001>

<bundles_post_ra>
// kernel: lstm_model_forward.1
= control target key start
LH: loop header
LB: loop body
LE: loop exit
PB: predicated region body
PF: predicated region fallthrough
CT: control target
= control target key end

     0   :  { %vm51_vm0 = vcmask 130048   ;;  %vm203_vm1 = vcmask 261120   ;;  %vm205_vm2 = vcmask 523264   ;;  %s1665_s1 = inlined_call_operand.vmem [shape: f32[16,128], index: 1, kind: input, shape index: {}]   ;;  %s1666_s0 = inlined_call_operand.vmem [shape: f32[64,16], index: 0, kind: input, shape index: {}]   ;;  %s1667_s3 = inlined_call_operand.vmem [shape: f32[1,256], index: 3, kind: input, shape index: {}]   ;;  %s1668_s4 = inlined_call_operand.vmem [shape: f32[1,256], index: 4, kind: input, shape index: {}]   ;;  %s1669_s5 = inlined_call_operand.vmem [shape: f32[1,256], index: 5, kind: input, shape index: {}]   ;;  %s1670_s2 = inlined_call_operand.vmem [shape: f32[64,256], index: 2, kind: input, shape index: {}]   ;;  %s1671_s6 = inlined_call_operand.vmem [shape: f32[32,64], index: 6, kind: input, shape index: {}]   ;;  %s1672_s7 = inlined_call_operand.vmem [shape: f32[1,64], index: 7, kind: input, shape index: {}]   ;;  %s1673_s8 = inlined_call_operand.vmem [shape: f32[64,32], index: 8, kind: input, shape index: {}]   ;;  %s1674_s9 = inlined_call_operand.vmem [shape: f32[1,32], index: 9, kind: input, shape index: {}]   ;;  %s1675_s10 = inlined_call_operand.vmem [shape: f32[32,128], index: 10, kind: input, shape index: {}]   ;;  %s1676_s11 = inlined_call_operand.vmem [shape: f32[1,128], index: 11, kind: input, shape index: {}]   ;;  %s1677_s12 = inlined_call_operand.vmem [shape: f32[8,128], index: 12, kind: output, shape index: {}]  }
   0x1   :  { %v50_v0 = vld [vmem:[%s1665_s1 + $0x8] sm:$0xff]  ;;  %v49_v1 = vld [vmem:[%s1665_s1] sm:$0xff]  ;;  %v1234_v20 = vld [vmem:[%s1670_s2 + $0x70] sm:$0xff] }
   0x2   :  { %90 = vmatpush.msra.mxu0 %v50_v0  ;;  %v41_v2 = vld [vmem:[%s1666_s0] sm:$0xff]  ;;  %v1239_v21 = vld [vmem:[%s1670_s2 + $0x78] sm:$0xff]  ;;  %217 = vmatpush.msra.mxu1 %v1234_v20  ;;  %v1251_v23 = vld [vmem:[%s1670_s2 + $0x68] sm:$0xff] }
   0x3   :  { %v1201_v3 = vld [vmem:[%s1667_s3] sm:$0x3]  ;;  %s1121_s3 = smov 64   ;;  %237 = vmatpush.msra.mxu2 %v1239_v21  ;;  %v1256_v24 = vld [vmem:[%s1670_s2 + $0x50] sm:$0xff]  ;;  %v1261_v25 = vld [vmem:[%s1670_s2 + $0x58] sm:$0xff]  ;;  %313 = vmatpush.msra.mxu3 %v1234_v20 }
   0x4   :  { %91 = vmatpush.msra.mxu0 %v49_v1  ;;  %v1204_v4 = vperm.slane %v1201_v3, 0  ;;  %v1210_v7 = vld [vmem:[%s1668_s4] sm:$0x3]  ;;  %s1122_s4 = smov 32   ;;  %v1275_v27 = vld [vmem:[%s1670_s2 + $0x48] sm:$0xff]  ;;  %v1287_v29 = vld [vmem:[%s1670_s2 + $0x30] sm:$0xff] }
   0x5   :  { %1026 = vmatmul.msk.f32.vlgmr.msra.gmra.mxu0 %vm51_vm0, %v41_v2  ;;  %v1215_v8 = vld [vmem:[%s1669_s5] sm:$0x3]  ;;  %v1218_v9 = vperm.slane %v1210_v7, 0  ;;  %238 = vmatpush.msra.mxu2 %v1251_v23  ;;  %v42_v28 = vld [vmem:[%s1666_s0 + $0x8] sm:$0xff]  ;;  %v1292_v30 = vld [vmem:[%s1670_s2 + $0x38] sm:$0xff]  ;;  %v1393_v45 = vperm.slane %v1201_v3, 1 }
   0x6   :  { %v1221_v10 = vperm.slane %v1215_v8, 0  ;;  %v1244_v22 = vld [vmem:[%s1670_s2 + $0x60] sm:$0xff]  ;;  %793 = vmatpush.msrb.mxu0 %v1234_v20  ;;  %v1306_v32 = vld [vmem:[%s1670_s2 + $0x28] sm:$0xff]  ;;  %v1315_v33 = vld [vmem:[%s1670_s2 + $0x10] sm:$0xff]  ;;  %v1398_v50 = vperm.slane %v1210_v7, 1  ;;  %v1404_v54 = vperm.slane %v1215_v8, 1 }
   0x7   :  { %218 = vmatpush.msra.mxu1 %v1244_v22  ;;  %v1270_v26 = vld [vmem:[%s1670_s2 + $0x40] sm:$0xff]  ;;  %314 = vmatpush.msra.mxu3 %v1244_v22  ;;  %v1320_v34 = vld [vmem:[%s1670_s2 + $0x18] sm:$0xff]  ;;  %v1342_v38 = vld [vmem:[%s1670_s2 + $0x8] sm:$0xff] }
   0x8   :  { %794 = vmatpush.msrb.mxu0 %v1244_v22  ;;  %239 = vmatpush.msra.mxu2 %v1261_v25  ;;  %v1301_v31 = vld [vmem:[%s1670_s2 + $0x20] sm:$0xff] }
   0x9   :  { %219 = vmatpush.msra.mxu1 %v1256_v24  ;;  %315 = vmatpush.msra.mxu3 %v1256_v24  ;;  %v1337_v37 = vld [vmem:[%s1670_s2] sm:$0xff] }
   0xa   :  { %240 = vmatpush.msra.mxu2 %v1275_v27  ;;  %795 = vmatpush.msrb.mxu0 %v1256_v24 }
   0xb   :  { %220 = vmatpush.msra.mxu1 %v1270_v26  ;;  %316 = vmatpush.msra.mxu3 %v1270_v26 }
   0xc   :  { %241 = vmatpush.msra.mxu2 %v1292_v30  ;;  %796 = vmatpush.msrb.mxu0 %v1270_v26 }
   0xd   :  { %1027 = vmatmul.msk.f32.gmra.mxu0 %vm51_vm0, %v42_v28  ;;  %221 = vmatpush.msra.mxu1 %v1287_v29 }
   0xe   :  { %317 = vmatpush.msra.mxu3 %v1287_v29  ;;  %242 = vmatpush.msra.mxu2 %v1306_v32 }
   0xf   :  { %222 = vmatpush.msra.mxu1 %v1301_v31  ;;  %797 = vmatpush.msrb.mxu0 %v1287_v29 }
  0x10   :  { %318 = vmatpush.msra.mxu3 %v1301_v31  ;;  %243 = vmatpush.msra.mxu2 %v1320_v34 }
  0x11   :  { %223 = vmatpush.msra.mxu1 %v1315_v33  ;;  %798 = vmatpush.msrb.mxu0 %v1301_v31 }
  0x12   :  { %319 = vmatpush.msra.mxu3 %v1315_v33  ;;  %244 = vmatpush.msra.mxu2 %v1342_v38 }
  0x13   :  { %799 = vmatpush.msrb.mxu0 %v1315_v33  ;;  %224 = vmatpush.msra.mxu1 %v1337_v37 }
  0x14   :  { %320 = vmatpush.msra.mxu3 %v1337_v37  ;;  %409 = vmatpush.msrb.mxu2 %v1234_v20 }
  0x15   :  { %333 = vmatpush.msrb.mxu1 %v1239_v21  ;;  %800 = vmatpush.msrb.mxu0 %v1337_v37 }
  0x16   :  { %429 = vmatpush.msrb.mxu3 %v1239_v21  ;;  %410 = vmatpush.msrb.mxu2 %v1244_v22 }
  0x17   :  { %334 = vmatpush.msrb.mxu1 %v1251_v23 }
  0x18   :  { %430 = vmatpush.msrb.mxu3 %v1251_v23  ;;  %411 = vmatpush.msrb.mxu2 %v1256_v24 }
  0x19   :  { %335 = vmatpush.msrb.mxu1 %v1261_v25 }
  0x1a   :  { %431 = vmatpush.msrb.mxu3 %v1261_v25  ;;  %412 = vmatpush.msrb.mxu2 %v1270_v26 }
  0x1b   :  { %336 = vmatpush.msrb.mxu1 %v1275_v27 }
  0x1c   :  { %432 = vmatpush.msrb.mxu3 %v1275_v27  ;;  %413 = vmatpush.msrb.mxu2 %v1287_v29 }
  0x1d   :  { %337 = vmatpush.msrb.mxu1 %v1292_v30 }
  0x1e   :  { %433 = vmatpush.msrb.mxu3 %v1292_v30  ;;  %414 = vmatpush.msrb.mxu2 %v1301_v31 }
  0x1f   :  { %338 = vmatpush.msrb.mxu1 %v1306_v32 }
  0x20   :  { %434 = vmatpush.msrb.mxu3 %v1306_v32  ;;  %415 = vmatpush.msrb.mxu2 %v1315_v33 }
  0x21   :  { %339 = vmatpush.msrb.mxu1 %v1320_v34 }
  0x22   :  { %435 = vmatpush.msrb.mxu3 %v1320_v34  ;;  %416 = vmatpush.msrb.mxu2 %v1337_v37 }
  0x23   :  { %340 = vmatpush.msrb.mxu1 %v1342_v38 }
  0x24   :  { %436 = vmatpush.msrb.mxu3 %v1342_v38 }
  0x82   :  { %v93_v5 = vpop.f32.mrf.mxu0 }
  0x83   :  { %v123_v6 = vadd.f32 %v1204_v4, %v93_v5 }
  0x85   :  { %1057 = vtanh.f32 %v123_v6 }
  0x8a   :  { %v96_v41 = vpop.f32.mrf.mxu0 }
  0x8b   :  { %v1058_v11 = vpop.eup %1057  ;;  %v125_v42 = vadd.f32 %v1204_v4, %v96_v41 }
  0x8c   :  { %v178_v12 = vmul.f32 %v1058_v11, %v1218_v9  ;;  %v43_v11 = vld [vmem:[%s1666_s0 + $0x10] sm:$0xff] }
  0x8d   :  { %1028 = vmatmul.msk.f32.gmra.mxu0 %vm51_vm0, %v43_v11 }
  0x8e   :  { %v179_v13 = vadd.f32 %v178_v12, %v1221_v10 }
  0x90   :  { %182 = vrot.lane.b32.xlu0 %v179_v13, %s1121_s3  ;;  %v180_v16 = vmul.f32 0.0, %v179_v13 }
 0x102   :  { %v183_v14 = vpop.permute.xlu0 %182 }
 0x103   :  { %v185_v15 = vmul.f32 %v183_v14, %v179_v13 }
 0x105   :  { %187 = vrot.lane.b32.xlu0 %v185_v15, %s1122_s4 }
 0x177   :  { %v188_v17 = vpop.permute.xlu0 %187 }
 0x178   :  { %v1227_v18 = vadd.f32 %v188_v17, %v180_v16  ;;  %v99_v16 = vpop.f32.mrf.mxu0 }
 0x17a   :  { %1059 = vtanh.f32 %v1227_v18 }
 0x180   :  { %v1060_v19 = vpop.eup %1059 }
 0x181   :  { %193 = vrot.lane.b32.xlu1 %v1060_v19, %s1121_s3 }
 0x1f3   :  { %v194_v35 = vpop.permute.xlu1 %193 }
 0x1f4   :  { %v196_v36 = vmul.f32 %v194_v35, %v179_v13 }
 0x1f6   :  { %200 = vrot.lane.b32.xlu1 %v196_v36, %s1122_s4 }
 0x268   :  { %v201_v39 = vpop.permute.xlu1 %200 }
 0x269   :  { %v204_v40 = vsel %vm203_vm1, %v201_v39, 0.0 }
 0x26a   :  { %1034 = vmatmul.msk.f32.vlgmr.msra.gmra.mxu1 %vm205_vm2, %v204_v40  ;;  %1035 = vmatmul.msk.f32.vlgmr.msra.gmra.mxu2 %vm205_vm2, %v204_v40 }
 0x26b   :  { %505 = vmatpush.msra.mxu1 %v1234_v20  ;;  %525 = vmatpush.msra.mxu2 %v1239_v21 }
 0x26d   :  { %506 = vmatpush.msra.mxu1 %v1244_v22  ;;  %526 = vmatpush.msra.mxu2 %v1251_v23 }
 0x26f   :  { %507 = vmatpush.msra.mxu1 %v1256_v24  ;;  %527 = vmatpush.msra.mxu2 %v1261_v25 }
 0x271   :  { %508 = vmatpush.msra.mxu1 %v1270_v26  ;;  %528 = vmatpush.msra.mxu2 %v1275_v27 }
 0x273   :  { %509 = vmatpush.msra.mxu1 %v1287_v29  ;;  %529 = vmatpush.msra.mxu2 %v1292_v30 }
 0x275   :  { %510 = vmatpush.msra.mxu1 %v1301_v31  ;;  %530 = vmatpush.msra.mxu2 %v1306_v32 }
 0x277   :  { %511 = vmatpush.msra.mxu1 %v1315_v33  ;;  %531 = vmatpush.msra.mxu2 %v1320_v34 }
 0x279   :  { %512 = vmatpush.msra.mxu1 %v1337_v37  ;;  %532 = vmatpush.msra.mxu2 %v1342_v38 }
 0x2e7   :  { %v226_v43 = vpop.f32.mrf.mxu1 }
 0x2e8   :  { %v249_v44 = vadd.f32 %v226_v43, %v125_v42 }
 0x2ea   :  { %1061 = vtanh.f32 %v249_v44 }
 0x2ed   :  { %v246_v46 = vpop.f32.mrf.mxu2 }
 0x2ee   :  { %v250_v47 = vadd.f32 %v246_v46, %v1393_v45 }
 0x2f0   :  { %v1062_v48 = vpop.eup %1061  ;;  %1063 = vtanh.f32 %v250_v47 }
 0x2f1   :  { %v253_v49 = vmul.f32 %v1062_v48, %v1218_v9 }
 0x2f3   :  { %v255_v51 = vadd.f32 %v253_v49, %v1221_v10 }
 0x2f5   :  { %259 = vrot.lane.b32.xlu2 %v255_v51, %s1121_s3  ;;  %v257_v60 = vmul.f32 %v255_v51, %v1227_v18  ;;  %v126_v18 = vadd.f32 %v1204_v4, %v99_v16 }
 0x2f6   :  { %v1064_v52 = vpop.eup %1063 }
 0x2f7   :  { %v254_v53 = vmul.f32 %v1064_v52, %v1398_v50 }
 0x2f9   :  { %v256_v55 = vadd.f32 %v254_v53, %v1404_v54 }
 0x2fb   :  { %v274_v63 = vmul.f32 0.0, %v256_v55 }
 0x2fd   :  { %276 = vrot.lane.b32.xlu2 %v256_v55, %s1121_s3 }
 0x34f   :  { %v260_v56 = vpop.permute.xlu2 %259 }
 0x350   :  { %v262_v57 = vmul.f32 %v260_v56, %v255_v51 }
 0x352   :  { %264 = vrot.lane.b32.xlu0 %v262_v57, %s1122_s4 }
 0x357   :  { %v277_v58 = vpop.permute.xlu2 %276 }
 0x358   :  { %v279_v59 = vmul.f32 %v277_v58, %v256_v55 }
 0x35a   :  { %281 = vrot.lane.b32.xlu1 %v279_v59, %s1122_s4 }
 0x3c4   :  { %v265_v61 = vpop.permute.xlu0 %264 }
 0x3c5   :  { %v267_v62 = vadd.f32 %v265_v61, %v257_v60 }
 0x3c7   :  { %1065 = vtanh.f32 %v267_v62 }
 0x3cc   :  { %v282_v0 = vpop.permute.xlu1 %281 }
 0x3cd   :  { %v1066_v1 = vpop.eup %1065  ;;  %v284_v2 = vadd.f32 %v282_v0, %v274_v63 }
 0x3ce   :  { %270 = vrot.lane.b32.xlu2 %v1066_v1, %s1121_s3 }
 0x3cf   :  { %1067 = vtanh.f32 %v284_v2 }
 0x3d5   :  { %v1068_v3 = vpop.eup %1067 }
 0x3d6   :  { %287 = vrot.lane.b32.xlu0 %v1068_v3, %s1121_s3 }
 0x428   :  { %v271_v5 = vpop.permute.xlu2 %270 }
 0x429   :  { %v273_v6 = vmul.f32 %v271_v5, %v255_v51 }
 0x42b   :  { %294 = vrot.lane.b32.xlu1 %v273_v6, %s1122_s4 }
 0x448   :  { %v288_v7 = vpop.permute.xlu0 %287 }
 0x449   :  { %v290_v8 = vmul.f32 %v288_v7, %v256_v55 }
 0x44b   :  { %298 = vrot.lane.b32.xlu2 %v290_v8, %s1121_s3 }
 0x49d   :  { %v295_v12 = vpop.permute.xlu1 %294 }
 0x4a5   :  { %v299_v13 = vpop.permute.xlu2 %298 }
 0x4a6   :  { %v301_v14 = vsel %vm203_vm1, %v295_v12, %v299_v13 }
 0x4a7   :  { %1036 = vmatmul.msk.f32.vlgmr.msra.gmra.mxu3 %vm205_vm2, %v301_v14  ;;  %1037 = vmatmul.msk.f32.vlgmr.msrb.gmra.mxu1 %vm205_vm2, %v301_v14 }
 0x4a8   :  { %601 = vmatpush.msra.mxu3 %v1234_v20  ;;  %621 = vmatpush.msrb.mxu1 %v1239_v21 }
 0x4aa   :  { %602 = vmatpush.msra.mxu3 %v1244_v22  ;;  %622 = vmatpush.msrb.mxu1 %v1251_v23 }
 0x4ac   :  { %603 = vmatpush.msra.mxu3 %v1256_v24  ;;  %623 = vmatpush.msrb.mxu1 %v1261_v25 }
 0x4ae   :  { %604 = vmatpush.msra.mxu3 %v1270_v26  ;;  %624 = vmatpush.msrb.mxu1 %v1275_v27 }
 0x4b0   :  { %605 = vmatpush.msra.mxu3 %v1287_v29  ;;  %625 = vmatpush.msrb.mxu1 %v1292_v30 }
 0x4b2   :  { %606 = vmatpush.msra.mxu3 %v1301_v31  ;;  %626 = vmatpush.msrb.mxu1 %v1306_v32 }
 0x4b4   :  { %607 = vmatpush.msra.mxu3 %v1315_v33  ;;  %627 = vmatpush.msrb.mxu1 %v1320_v34 }
 0x4b6   :  { %608 = vmatpush.msra.mxu3 %v1337_v37  ;;  %628 = vmatpush.msrb.mxu1 %v1342_v38 }
 0x524   :  { %v342_v15 = vpop.f32.mrf.mxu1 }
 0x525   :  { %v346_v17 = vadd.f32 %v342_v15, %v1393_v45 }
 0x527   :  { %1069 = vtanh.f32 %v346_v17 }
 0x52a   :  { %v322_v19 = vpop.f32.mrf.mxu3 }
 0x52b   :  { %v345_v28 = vadd.f32 %v322_v19, %v126_v18 }
 0x52d   :  { %v1070_v35 = vpop.eup %1069  ;;  %1071 = vtanh.f32 %v345_v28 }
 0x52e   :  { %v350_v36 = vmul.f32 %v1070_v35, %v1398_v50 }
 0x530   :  { %v352_v39 = vadd.f32 %v350_v36, %v1404_v54 }
 0x532   :  { %372 = vrot.lane.b32.xlu1 %v352_v39, %s1121_s3  ;;  %v370_v53 = vmul.f32 %v352_v39, %v284_v2 }
 0x533   :  { %v1072_v40 = vpop.eup %1071 }
 0x534   :  { %v349_v41 = vmul.f32 %v1072_v40, %v1218_v9 }
 0x536   :  { %v351_v42 = vadd.f32 %v349_v41, %v1221_v10  ;;  %v45_v41 = vld [vmem:[%s1666_s0 + $0x20] sm:$0xff] }
 0x538   :  { %355 = vrot.lane.b32.xlu0 %v351_v42, %s1121_s3  ;;  %v353_v48 = vmul.f32 %v351_v42, %v267_v62  ;;  %v44_v62 = vld [vmem:[%s1666_s0 + $0x18] sm:$0xff] }
 0x539   :  { %1029 = vmatmul.msk.f32.gmra.mxu0 %vm51_vm0, %v44_v62 }
 0x541   :  { %1030 = vmatmul.msk.f32.gmra.mxu0 %vm51_vm0, %v45_v41 }
 0x5a4   :  { %v373_v43 = vpop.permute.xlu1 %372 }
 0x5a5   :  { %v375_v44 = vmul.f32 %v373_v43, %v352_v39 }
 0x5a7   :  { %377 = vrot.lane.b32.xlu0 %v375_v44, %s1122_s4 }
 0x5aa   :  { %v356_v46 = vpop.permute.xlu0 %355 }
 0x5ab   :  { %v358_v47 = vmul.f32 %v356_v46, %v351_v42 }
 0x5ad   :  { %360 = vrot.lane.b32.xlu2 %v358_v47, %s1122_s4 }
 0x607   :  { %v361_v49 = vpop.permute.xlu2 %360 }
 0x608   :  { %v363_v51 = vadd.f32 %v361_v49, %v353_v48 }
 0x60a   :  { %1073 = vtanh.f32 %v363_v51 }
 0x610   :  { %v1074_v52 = vpop.eup %1073 }
 0x611   :  { %366 = vrot.lane.b32.xlu1 %v1074_v52, %s1121_s3 }
 0x619   :  { %v378_v55 = vpop.permute.xlu0 %377 }
 0x61a   :  { %v380_v56 = vadd.f32 %v378_v55, %v370_v53 }
 0x61c   :  { %1075 = vtanh.f32 %v380_v56 }
 0x622   :  { %v1076_v57 = vpop.eup %1075 }
 0x623   :  { %383 = vrot.lane.b32.xlu2 %v1076_v57, %s1121_s3 }
 0x67d   :  { %v384_v58 = vpop.permute.xlu2 %383 }
 0x67e   :  { %v386_v59 = vmul.f32 %v384_v58, %v352_v39 }
 0x680   :  { %394 = vrot.lane.b32.xlu1 %v386_v59, %s1121_s3 }
 0x683   :  { %v367_v60 = vpop.permute.xlu1 %366 }
 0x684   :  { %v369_v61 = vmul.f32 %v367_v60, %v351_v42 }
 0x686   :  { %390 = vrot.lane.b32.xlu0 %v369_v61, %s1122_s4 }
 0x6f2   :  { %v395_v63 = vpop.permute.xlu1 %394 }
 0x6f8   :  { %v391_v0 = vpop.permute.xlu0 %390 }
 0x6f9   :  { %v397_v1 = vsel %vm203_vm1, %v391_v0, %v395_v63 }
 0x6fa   :  { %1038 = vmatmul.msk.f32.vlgmr.msrb.gmra.mxu2 %vm205_vm2, %v397_v1  ;;  %1039 = vmatmul.msk.f32.vlgmr.msrb.gmra.mxu3 %vm205_vm2, %v397_v1 }
 0x6fb   :  { %697 = vmatpush.msrb.mxu2 %v1234_v20  ;;  %717 = vmatpush.msrb.mxu3 %v1239_v21  ;;  %v102_v20 = vpop.f32.mrf.mxu0 }
 0x6fd   :  { %698 = vmatpush.msrb.mxu2 %v1244_v22  ;;  %718 = vmatpush.msrb.mxu3 %v1251_v23  ;;  %v127_v22 = vadd.f32 %v1204_v4, %v102_v20 }
 0x6ff   :  { %699 = vmatpush.msrb.mxu2 %v1256_v24  ;;  %719 = vmatpush.msrb.mxu3 %v1261_v25 }
 0x701   :  { %700 = vmatpush.msrb.mxu2 %v1270_v26  ;;  %720 = vmatpush.msrb.mxu3 %v1275_v27 }
 0x703   :  { %701 = vmatpush.msrb.mxu2 %v1287_v29  ;;  %721 = vmatpush.msrb.mxu3 %v1292_v30 }
 0x705   :  { %702 = vmatpush.msrb.mxu2 %v1301_v31  ;;  %722 = vmatpush.msrb.mxu3 %v1306_v32 }
 0x707   :  { %703 = vmatpush.msrb.mxu2 %v1315_v33  ;;  %723 = vmatpush.msrb.mxu3 %v1320_v34 }
 0x709   :  { %704 = vmatpush.msrb.mxu2 %v1337_v37  ;;  %724 = vmatpush.msrb.mxu3 %v1342_v38 }
 0x77d   :  { %v418_v24 = vpop.f32.mrf.mxu2  ;;  %v438_v26 = vpop.f32.mrf.mxu3 }
 0x77e   :  { %v441_v29 = vadd.f32 %v418_v24, %v127_v22  ;;  %v442_v2 = vadd.f32 %v438_v26, %v1393_v45  ;;  %v46_v24 = vld [vmem:[%s1666_s0 + $0x28] sm:$0xff] }
 0x77f   :  { %1031 = vmatmul.msk.f32.gmra.mxu0 %vm51_vm0, %v46_v24 }
 0x780   :  { %1077 = vtanh.f32 %v441_v29 }
 0x781   :  { %1079 = vtanh.f32 %v442_v2 }
 0x786   :  { %v1078_v31 = vpop.eup %1077 }
 0x787   :  { %v1080_v3 = vpop.eup %1079  ;;  %v445_v33 = vmul.f32 %v1078_v31, %v1218_v9 }
 0x788   :  { %v446_v5 = vmul.f32 %v1080_v3, %v1398_v50 }
 0x789   :  { %v447_v37 = vadd.f32 %v445_v33, %v1221_v10 }
 0x78a   :  { %v448_v6 = vadd.f32 %v446_v5, %v1404_v54 }
 0x78b   :  { %451 = vrot.lane.b32.xlu2 %v447_v37, %s1121_s3  ;;  %v449_v13 = vmul.f32 %v447_v37, %v363_v51 }
 0x78c   :  { %468 = vrot.lane.b32.xlu0 %v448_v6, %s1121_s3  ;;  %v466_v15 = vmul.f32 %v448_v6, %v380_v56 }
 0x7e5   :  { %v452_v7 = vpop.permute.xlu2 %451 }
 0x7e6   :  { %v454_v8 = vmul.f32 %v452_v7, %v447_v37 }
 0x7e8   :  { %456 = vrot.lane.b32.xlu1 %v454_v8, %s1122_s4 }
 0x7fe   :  { %v469_v11 = vpop.permute.xlu0 %468 }
 0x7ff   :  { %v471_v12 = vmul.f32 %v469_v11, %v448_v6 }
 0x801   :  { %473 = vrot.lane.b32.xlu2 %v471_v12, %s1122_s4 }
 0x85a   :  { %v457_v14 = vpop.permute.xlu1 %456 }
 0x85b   :  { %v1485_v16 = vadd.f32 %v457_v14, %v449_v13  ;;  %v474_v17 = vpop.permute.xlu2 %473 }
 0x85c   :  { %v476_v18 = vadd.f32 %v474_v17, %v466_v15 }
 0x85d   :  { %1081 = vtanh.f32 %v1485_v16 }
 0x85e   :  { %1083 = vtanh.f32 %v476_v18 }
 0x863   :  { %v1082_v19 = vpop.eup %1081 }
 0x864   :  { %v1084_v28 = vpop.eup %1083  ;;  %462 = vrot.lane.b32.xlu0 %v1082_v19, %s1121_s3 }
 0x865   :  { %479 = vrot.lane.b32.xlu1 %v1084_v28, %s1121_s3 }
 0x8d6   :  { %v463_v35 = vpop.permute.xlu0 %462 }
 0x8d7   :  { %v480_v36 = vpop.permute.xlu1 %479  ;;  %v465_v39 = vmul.f32 %v463_v35, %v447_v37 }
 0x8d8   :  { %v482_v40 = vmul.f32 %v480_v36, %v448_v6 }
 0x8d9   :  { %486 = vrot.lane.b32.xlu2 %v465_v39, %s1122_s4 }
 0x8da   :  { %490 = vrot.lane.b32.xlu0 %v482_v40, %s1121_s3 }
 0x933   :  { %v487_v42 = vpop.permute.xlu2 %486 }
 0x94c   :  { %v491_v43 = vpop.permute.xlu0 %490 }
 0x94d   :  { %v493_v44 = vsel %vm203_vm1, %v487_v42, %v491_v43 }
 0x94e   :  { %1040 = vmatmul.msk.f32.vlgmr.msra.gmra.mxu1 %vm205_vm2, %v493_v44  ;;  %1041 = vmatmul.msk.f32.vlgmr.msra.gmra.mxu2 %vm205_vm2, %v493_v44 }
 0x94f   :  { %813 = vmatpush.msra.mxu1 %v1239_v21  ;;  %887 = vmatpush.msra.mxu2 %v1239_v21  ;;  %v105_v21 = vpop.f32.mrf.mxu0 }
 0x951   :  { %814 = vmatpush.msra.mxu1 %v1251_v23  ;;  %888 = vmatpush.msra.mxu2 %v1251_v23  ;;  %v128_v23 = vadd.f32 %v1204_v4, %v105_v21 }
 0x953   :  { %815 = vmatpush.msra.mxu1 %v1261_v25  ;;  %889 = vmatpush.msra.mxu2 %v1261_v25 }
 0x955   :  { %816 = vmatpush.msra.mxu1 %v1275_v27  ;;  %890 = vmatpush.msra.mxu2 %v1275_v27 }
 0x957   :  { %817 = vmatpush.msra.mxu1 %v1292_v30  ;;  %891 = vmatpush.msra.mxu2 %v1292_v30  ;;  %v108_v3 = vpop.f32.mrf.mxu0 }
 0x958   :  { %v129_v5 = vadd.f32 %v1204_v4, %v108_v3 }
 0x959   :  { %818 = vmatpush.msra.mxu1 %v1306_v32  ;;  %892 = vmatpush.msra.mxu2 %v1306_v32 }
 0x95b   :  { %819 = vmatpush.msra.mxu1 %v1320_v34  ;;  %893 = vmatpush.msra.mxu2 %v1320_v34 }
 0x95d   :  { %820 = vmatpush.msra.mxu1 %v1342_v38  ;;  %894 = vmatpush.msra.mxu2 %v1342_v38 }
 0x9cb   :  { %v514_v25 = vpop.f32.mrf.mxu1 }
 0x9cc   :  { %v537_v27 = vadd.f32 %v514_v25, %v128_v23  ;;  %v47_v25 = vld [vmem:[%s1666_s0 + $0x30] sm:$0xff] }
 0x9cd   :  { %1032 = vmatmul.msk.f32.gmra.mxu0 %vm51_vm0, %v47_v25 }
 0x9ce   :  { %1085 = vtanh.f32 %v537_v27 }
 0x9d1   :  { %v534_v46 = vpop.f32.mrf.mxu2 }
 0x9d2   :  { %v538_v30 = vadd.f32 %v534_v46, %v1393_v45 }
 0x9d4   :  { %v1086_v47 = vpop.eup %1085  ;;  %1087 = vtanh.f32 %v538_v30 }
 0x9d5   :  { %v541_v32 = vmul.f32 %v1086_v47, %v1218_v9 }
 0x9d7   :  { %v543_v48 = vadd.f32 %v541_v32, %v1221_v10 }
 0x9d9   :  { %547 = vrot.lane.b32.xlu1 %v543_v48, %s1121_s3  ;;  %v545_v60 = vmul.f32 %v543_v48, %v1485_v16 }
 0x9da   :  { %v1088_v34 = vpop.eup %1087 }
 0x9db   :  { %v542_v38 = vmul.f32 %v1088_v34, %v1398_v50 }
 0x9dd   :  { %v544_v49 = vadd.f32 %v542_v38, %v1404_v54 }
 0x9df   :  { %564 = vrot.lane.b32.xlu2 %v544_v49, %s1121_s3  ;;  %v562_v56 = vmul.f32 %v544_v49, %v476_v18 }
 0xa39   :  { %v565_v51 = vpop.permute.xlu2 %564 }
 0xa3a   :  { %v567_v52 = vmul.f32 %v565_v51, %v544_v49 }
 0xa3c   :  { %569 = vrot.lane.b32.xlu1 %v567_v52, %s1122_s4 }
 0xa4a   :  { %v111_v47 = vpop.f32.mrf.mxu0 }
 0xa4b   :  { %v548_v53 = vpop.permute.xlu1 %547  ;;  %v130_v32 = vadd.f32 %v1204_v4, %v111_v47 }
 0xa4c   :  { %v550_v55 = vmul.f32 %v548_v53, %v543_v48 }
 0xa4e   :  { %552 = vrot.lane.b32.xlu0 %v550_v55, %s1122_s4 }
 0xaae   :  { %v570_v57 = vpop.permute.xlu1 %569 }
 0xaaf   :  { %v572_v58 = vadd.f32 %v570_v57, %v562_v56 }
 0xab1   :  { %1089 = vtanh.f32 %v572_v58 }
 0xab7   :  { %v1090_v59 = vpop.eup %1089 }
 0xab8   :  { %575 = vrot.lane.b32.xlu0 %v1090_v59, %s1121_s3 }
 0xac0   :  { %v553_v61 = vpop.permute.xlu0 %552 }
 0xac1   :  { %v555_v62 = vadd.f32 %v553_v61, %v545_v60 }
 0xac3   :  { %1091 = vtanh.f32 %v555_v62 }
 0xac9   :  { %v1092_v63 = vpop.eup %1091 }
 0xaca   :  { %558 = vrot.lane.b32.xlu2 %v1092_v63, %s1121_s3 }
 0xb24   :  { %v559_v0 = vpop.permute.xlu2 %558 }
 0xb25   :  { %v561_v1 = vmul.f32 %v559_v0, %v543_v48 }
 0xb27   :  { %582 = vrot.lane.b32.xlu1 %v561_v1, %s1122_s4 }
 0xb2a   :  { %v576_v20 = vpop.permute.xlu0 %575 }
 0xb2b   :  { %v578_v22 = vmul.f32 %v576_v20, %v544_v49 }
 0xb2d   :  { %586 = vrot.lane.b32.xlu2 %v578_v22, %s1121_s3 }
 0xb87   :  { %v587_v26 = vpop.permute.xlu2 %586 }
 0xb99   :  { %v583_v29 = vpop.permute.xlu1 %582 }
 0xb9a   :  { %v589_v2 = vsel %vm203_vm1, %v583_v29, %v587_v26 }
 0xb9b   :  { %1042 = vmatmul.msk.f32.vlgmr.msra.gmra.mxu3 %vm205_vm2, %v589_v2  ;;  %1043 = vmatmul.msk.f32.vlgmr.msrb.gmra.mxu1 %vm205_vm2, %v589_v2 }
 0xc18   :  { %v630_v31 = vpop.f32.mrf.mxu1 }
 0xc19   :  { %v634_v33 = vadd.f32 %v630_v31, %v1393_v45 }
 0xc1b   :  { %1093 = vtanh.f32 %v634_v33  ;;  %v48_v33 = vld [vmem:[%s1666_s0 + $0x38] sm:$0xff] }
 0xc1c   :  { %1033 = vmatmul.msk.f32.gmra.mxu0 %vm51_vm0, %v48_v33 }
 0xc1e   :  { %v610_v37 = vpop.f32.mrf.mxu3 }
 0xc1f   :  { %v633_v6 = vadd.f32 %v610_v37, %v129_v5 }
 0xc21   :  { %v1094_v7 = vpop.eup %1093  ;;  %1095 = vtanh.f32 %v633_v6 }
 0xc22   :  { %v638_v8 = vmul.f32 %v1094_v7, %v1398_v50 }
 0xc24   :  { %v640_v11 = vadd.f32 %v638_v8, %v1404_v54 }
 0xc26   :  { %660 = vrot.lane.b32.xlu1 %v640_v11, %s1121_s3  ;;  %v658_v39 = vmul.f32 %v640_v11, %v572_v58 }
 0xc27   :  { %v1096_v12 = vpop.eup %1095 }
 0xc28   :  { %v637_v13 = vmul.f32 %v1096_v12, %v1218_v9 }
 0xc2a   :  { %v639_v14 = vadd.f32 %v637_v13, %v1221_v10 }
 0xc2c   :  { %643 = vrot.lane.b32.xlu0 %v639_v14, %s1121_s3  ;;  %v641_v19 = vmul.f32 %v639_v14, %v555_v62 }
 0xc98   :  { %v661_v15 = vpop.permute.xlu1 %660 }
 0xc99   :  { %v663_v16 = vmul.f32 %v661_v15, %v640_v11  ;;  %v114_v7 = vpop.f32.mrf.mxu0 }
 0xc9a   :  { %v131_v8 = vadd.f32 %v1204_v4, %v114_v7  ;;  %v990_v7 = vld [vmem:[%s1675_s10] sm:$0xff] }
 0xc9b   :  { %665 = vrot.lane.b32.xlu0 %v663_v16, %s1122_s4 }
 0xc9e   :  { %v644_v17 = vpop.permute.xlu0 %643 }
 0xc9f   :  { %v646_v18 = vmul.f32 %v644_v17, %v639_v14 }
 0xca1   :  { %648 = vrot.lane.b32.xlu2 %v646_v18, %s1122_s4 }
 0xcfb   :  { %v649_v28 = vpop.permute.xlu2 %648 }
 0xcfc   :  { %v651_v35 = vadd.f32 %v649_v28, %v641_v19 }
 0xcfe   :  { %1097 = vtanh.f32 %v651_v35 }
 0xd04   :  { %v1098_v36 = vpop.eup %1097 }
 0xd05   :  { %654 = vrot.lane.b32.xlu1 %v1098_v36, %s1121_s3 }
 0xd0d   :  { %v666_v40 = vpop.permute.xlu0 %665 }
 0xd0e   :  { %v668_v41 = vadd.f32 %v666_v40, %v658_v39 }
 0xd10   :  { %1099 = vtanh.f32 %v668_v41 }
 0xd16   :  { %v1100_v42 = vpop.eup %1099 }
 0xd17   :  { %671 = vrot.lane.b32.xlu2 %v1100_v42, %s1121_s3 }
 0xd71   :  { %v672_v43 = vpop.permute.xlu2 %671 }
 0xd72   :  { %v674_v44 = vmul.f32 %v672_v43, %v640_v11 }
 0xd74   :  { %682 = vrot.lane.b32.xlu1 %v674_v44, %s1121_s3 }
 0xd77   :  { %v655_v21 = vpop.permute.xlu1 %654 }
 0xd78   :  { %v657_v23 = vmul.f32 %v655_v21, %v639_v14 }
 0xd7a   :  { %678 = vrot.lane.b32.xlu0 %v657_v23, %s1122_s4 }
 0xde6   :  { %v683_v27 = vpop.permute.xlu1 %682 }
 0xdec   :  { %v679_v46 = vpop.permute.xlu0 %678 }
 0xded   :  { %v685_v30 = vsel %vm203_vm1, %v679_v46, %v683_v27 }
 0xdee   :  { %1044 = vmatmul.msk.f32.vlgmr.msrb.gmra.mxu2 %vm205_vm2, %v685_v30  ;;  %1045 = vmatmul.msk.f32.vlgmr.msrb.gmra.mxu3 %vm205_vm2, %v685_v30 }
 0xe71   :  { %v706_v48 = vpop.f32.mrf.mxu2  ;;  %v726_v34 = vpop.f32.mrf.mxu3 }
 0xe72   :  { %v729_v38 = vadd.f32 %v706_v48, %v130_v32  ;;  %v730_v49 = vadd.f32 %v726_v34, %v1393_v45 }
 0xe74   :  { %1101 = vtanh.f32 %v729_v38 }
 0xe75   :  { %1103 = vtanh.f32 %v730_v49 }
 0xe7a   :  { %v1102_v51 = vpop.eup %1101 }
 0xe7b   :  { %v1104_v52 = vpop.eup %1103  ;;  %v733_v53 = vmul.f32 %v1102_v51, %v1218_v9 }
 0xe7c   :  { %v734_v55 = vmul.f32 %v1104_v52, %v1398_v50 }
 0xe7d   :  { %v735_v56 = vadd.f32 %v733_v53, %v1221_v10 }
 0xe7e   :  { %v736_v57 = vadd.f32 %v734_v55, %v1404_v54 }
 0xe7f   :  { %739 = vrot.lane.b32.xlu2 %v735_v56, %s1121_s3  ;;  %v737_v62 = vmul.f32 %v735_v56, %v651_v35 }
 0xe80   :  { %756 = vrot.lane.b32.xlu0 %v736_v57, %s1121_s3  ;;  %v754_v0 = vmul.f32 %v736_v57, %v668_v41 }
 0xed9   :  { %v740_v58 = vpop.permute.xlu2 %739 }
 0xeda   :  { %v742_v59 = vmul.f32 %v740_v58, %v735_v56 }
 0xedc   :  { %744 = vrot.lane.b32.xlu1 %v742_v59, %s1122_s4  ;;  %v920_v59 = vld [vmem:[%s1671_s6] sm:$0xff] }
 0xef2   :  { %v757_v60 = vpop.permute.xlu0 %756 }
 0xef3   :  { %v759_v61 = vmul.f32 %v757_v60, %v736_v57 }
 0xef5   :  { %761 = vrot.lane.b32.xlu2 %v759_v61, %s1122_s4 }
 0xf4e   :  { %v745_v63 = vpop.permute.xlu1 %744 }
 0xf4f   :  { %v747_v1 = vadd.f32 %v745_v63, %v737_v62  ;;  %v762_v20 = vpop.permute.xlu2 %761  ;;  %v961_v62 = vld [vmem:[%s1673_s8 + $0x38] sm:$0xff]  ;;  %v960_v63 = vld [vmem:[%s1673_s8 + $0x30] sm:$0xff] }
 0xf50   :  { %v764_v22 = vadd.f32 %v762_v20, %v754_v0  ;;  %977 = vmatpush.msra.mxu0 %v961_v62  ;;  %v959_v0 = vld [vmem:[%s1673_s8 + $0x28] sm:$0xff]  ;;  %v957_v20 = vld [vmem:[%s1673_s8 + $0x18] sm:$0xff] }
 0xf51   :  { %1105 = vtanh.f32 %v747_v1 }
 0xf52   :  { %1107 = vtanh.f32 %v764_v22  ;;  %978 = vmatpush.msra.mxu0 %v960_v63 }
 0xf54   :  { %979 = vmatpush.msra.mxu0 %v959_v0 }
 0xf57   :  { %v1106_v24 = vpop.eup %1105 }
 0xf58   :  { %v1108_v26 = vpop.eup %1107  ;;  %750 = vrot.lane.b32.xlu0 %v1106_v24, %s1121_s3  ;;  %v956_v24 = vld [vmem:[%s1673_s8 + $0x10] sm:$0xff] }
 0xf59   :  { %767 = vrot.lane.b32.xlu1 %v1108_v26, %s1121_s3  ;;  %v955_v26 = vld [vmem:[%s1673_s8 + $0x8] sm:$0xff] }
 0xfca   :  { %v751_v29 = vpop.permute.xlu0 %750 }
 0xfcb   :  { %v768_v2 = vpop.permute.xlu1 %767  ;;  %v753_v31 = vmul.f32 %v751_v29, %v735_v56  ;;  %v954_v29 = vld [vmem:[%s1673_s8] sm:$0xff] }
 0xfcc   :  { %v770_v3 = vmul.f32 %v768_v2, %v736_v57  ;;  %v993_v2 = vld [vmem:[%s1675_s10 + $0x18] sm:$0xff] }
 0xfcd   :  { %774 = vrot.lane.b32.xlu2 %v753_v31, %s1122_s4  ;;  %v992_v31 = vld [vmem:[%s1675_s10 + $0x10] sm:$0xff] }
 0xfce   :  { %778 = vrot.lane.b32.xlu0 %v770_v3, %s1121_s3  ;;  %v1054_v3 = vld [vmem:[%s1672_s7] ss:$0 sm:$0xff] }
0x1027   :  { %v775_v5 = vpop.permute.xlu2 %774 }
0x1040   :  { %v779_v37 = vpop.permute.xlu0 %778 }
0x1041   :  { %v781_v6 = vsel %vm203_vm1, %v775_v5, %v779_v37 }
0x1042   :  { %1046 = vmatmul.msk.f32.vlgmr.msrb.gmra.mxu0 %vm205_vm2, %v781_v6  ;;  %1047 = vmatmul.msk.f32.vlgmr.msra.gmra.mxu1 %vm205_vm2, %v781_v6  ;;  %v991_v6 = vld [vmem:[%s1675_s10 + $0x8] sm:$0xff] }
0x10bf   :  { %v802_v11 = vpop.f32.mrf.mxu0  ;;  %v822_v12 = vpop.f32.mrf.mxu1 }
0x10c0   :  { %v825_v13 = vadd.f32 %v802_v11, %v131_v8  ;;  %v826_v14 = vadd.f32 %v822_v12, %v1393_v45  ;;  %v1055_v8 = vld [vmem:[%s1674_s9] ss:$0 sm:$0xff] }
0x10c2   :  { %1109 = vtanh.f32 %v825_v13 }
0x10c3   :  { %1111 = vtanh.f32 %v826_v14  ;;  %v1056_v14 = vld [vmem:[%s1676_s11] ss:$0 sm:$0xff] }
0x10c8   :  { %v1110_v15 = vpop.eup %1109 }
0x10c9   :  { %v1112_v16 = vpop.eup %1111  ;;  %v829_v17 = vmul.f32 %v1110_v15, %v1218_v9 }
0x10ca   :  { %v830_v18 = vmul.f32 %v1112_v16, %v1398_v50 }
0x10cb   :  { %v831_v19 = vadd.f32 %v829_v17, %v1221_v10 }
0x10cc   :  { %v832_v28 = vadd.f32 %v830_v18, %v1404_v54 }
0x10cd   :  { %835 = vrot.lane.b32.xlu1 %v831_v19, %s1121_s3  ;;  %v833_v10 = vmul.f32 %v831_v19, %v747_v1  ;;  %v958_v1 = vld [vmem:[%s1673_s8 + $0x20] sm:$0xff] }
0x10ce   :  { %852 = vrot.lane.b32.xlu2 %v832_v28, %s1121_s3  ;;  %v850_v40 = vmul.f32 %v832_v28, %v764_v22  ;;  %980 = vmatpush.msra.mxu0 %v958_v1 }
0x10d0   :  { %981 = vmatpush.msra.mxu0 %v957_v20 }
0x10d2   :  { %982 = vmatpush.msra.mxu0 %v956_v24 }
0x10d4   :  { %983 = vmatpush.msra.mxu0 %v955_v26 }
0x10d6   :  { %984 = vmatpush.msra.mxu0 %v954_v29 }
0x1128   :  { %v853_v4 = vpop.permute.xlu2 %852 }
0x1129   :  { %v855_v35 = vmul.f32 %v853_v4, %v832_v28 }
0x112b   :  { %857 = vrot.lane.b32.xlu1 %v855_v35, %s1122_s4 }
0x113f   :  { %v836_v36 = vpop.permute.xlu1 %835 }
0x1140   :  { %v838_v39 = vmul.f32 %v836_v36, %v831_v19 }
0x1142   :  { %840 = vrot.lane.b32.xlu0 %v838_v39, %s1122_s4 }
0x119d   :  { %v858_v9 = vpop.permute.xlu1 %857 }
0x119e   :  { %v860_v41 = vadd.f32 %v858_v9, %v850_v40 }
0x11a0   :  { %1113 = vtanh.f32 %v860_v41 }
0x11a6   :  { %v1114_v42 = vpop.eup %1113 }
0x11a7   :  { %863 = vrot.lane.b32.xlu0 %v1114_v42, %s1121_s3 }
0x11b4   :  { %v841_v43 = vpop.permute.xlu0 %840 }
0x11b5   :  { %v843_v44 = vadd.f32 %v841_v43, %v833_v10 }
0x11b7   :  { %1115 = vtanh.f32 %v843_v44 }
0x11bd   :  { %v1116_v21 = vpop.eup %1115 }
0x11be   :  { %846 = vrot.lane.b32.xlu2 %v1116_v21, %s1121_s3 }
0x1218   :  { %v847_v23 = vpop.permute.xlu2 %846 }
0x1219   :  { %v864_v25 = vpop.permute.xlu0 %863  ;;  %v849_v27 = vmul.f32 %v847_v23, %v831_v19 }
0x121a   :  { %v866_v46 = vmul.f32 %v864_v25, %v832_v28 }
0x121b   :  { %868 = vrot.lane.b32.xlu1 %v849_v27, %s1122_s4 }
0x121c   :  { %872 = vrot.lane.b32.xlu2 %v866_v46, %s1121_s3 }
0x1276   :  { %v873_v30 = vpop.permute.xlu2 %872 }
0x128d   :  { %v869_v47 = vpop.permute.xlu1 %868 }
0x128e   :  { %v875_v32 = vsel %vm203_vm1, %v869_v47, %v873_v30 }
0x128f   :  { %1048 = vmatmul.msk.f32.vlgmr.msra.gmra.mxu2 %vm205_vm2, %v875_v32 }
0x1312   :  { %v896_v48 = vpop.f32.mrf.mxu2 }
0x1313   :  { %v899_v34 = vadd.f32 %v896_v48, %v1393_v45  ;;  %v923_v45 = vld [vmem:[%s1671_s6 + $0x18] sm:$0xff] }
0x1314   :  { %945 = vmatpush.msra.mxu3 %v923_v45 }
0x1315   :  { %1117 = vtanh.f32 %v899_v34 }
0x131b   :  { %v1118_v38 = vpop.eup %1117 }
0x131c   :  { %v901_v49 = vmul.f32 %v1118_v38, %v1398_v50  ;;  %v922_v50 = vld [vmem:[%s1671_s6 + $0x10] sm:$0xff] }
0x131d   :  { %946 = vmatpush.msra.mxu3 %v922_v50 }
0x131e   :  { %v902_v51 = vadd.f32 %v901_v49, %v1404_v54  ;;  %v921_v54 = vld [vmem:[%s1671_s6 + $0x8] sm:$0xff] }
0x131f   :  { %947 = vmatpush.msra.mxu3 %v921_v54 }
0x1320   :  { %905 = vrot.lane.b32.xlu0 %v902_v51, %s1121_s3  ;;  %v903_v55 = vmul.f32 %v902_v51, %v860_v41 }
0x1321   :  { %948 = vmatpush.msra.mxu3 %v920_v59 }
0x1323   :  { %1013 = vmatpush.msrb.mxu3 %v993_v2 }
0x1325   :  { %1014 = vmatpush.msrb.mxu3 %v992_v31 }
0x1327   :  { %1015 = vmatpush.msrb.mxu3 %v991_v6 }
0x1329   :  { %1016 = vmatpush.msrb.mxu3 %v990_v7 }
0x1392   :  { %v906_v52 = vpop.permute.xlu0 %905 }
0x1393   :  { %v908_v53 = vmul.f32 %v906_v52, %v902_v51 }
0x1395   :  { %910 = vrot.lane.b32.xlu1 %v908_v53, %s1122_s4 }
0x1407   :  { %v911_v56 = vpop.permute.xlu1 %910 }
0x1408   :  { %v913_v57 = vadd.f32 %v911_v56, %v903_v55 }
0x140a   :  { %1119 = vtanh.f32 %v913_v57 }
0x1410   :  { %v1120_v58 = vpop.eup %1119 }
0x1411   :  { %916 = vrot.lane.b32.xlu2 %v1120_v58, %s1121_s3 }
0x146b   :  { %v917_v60 = vpop.permute.xlu2 %916 }
0x146c   :  { %v919_v61 = vmul.f32 %v917_v60, %v902_v51 }
0x146e   :  { %929 = vrot.lane.b32.xlu0 %v919_v61, %s1122_s4 }
0x14e0   :  { %v930_v22 = vpop.permute.xlu0 %929 }
0x14e1   :  { %1049 = vmatmul.msk.f32.vlgmr.msra.gmra.mxu3 %vm203_vm1, %v930_v22 }
0x1564   :  { %v950_v33 = vpop.f32.mrf.mxu3 }
0x1565   :  { %v951_v5 = vadd.f32 %v1054_v3, %v950_v33 }
0x1567   :  { %v953_v37 = vmax.f32 %v951_v5, 0.0 }
0x1569   :  { %1050 = vmatmul.msk.f32.vlgmr.msra.gmra.mxu0 %vm205_vm2, %v953_v37 }
0x15e6   :  { %v986_v11 = vpop.f32.mrf.mxu0 }
0x15e7   :  { %v987_v12 = vadd.f32 %v1055_v8, %v986_v11 }
0x15e9   :  { %v989_v13 = vmax.f32 %v987_v12, 0.0 }
0x15eb   :  { %1051 = vmatmul.msk.f32.vlgmr.msrb.gmra.mxu3 %vm203_vm1, %v989_v13 }
0x166e   :  { %v1018_v15 = vpop.f32.mrf.mxu3 }
0x166f   :  { %v1019_v16 = vadd.f32 %v1056_v14, %v1018_v15 }
0x1671   :  { %1021 = vst [vmem:[%s1677_s12] sm:$0xff] %v1019_v16 }

</bundles_post_ra>
